<compile_context>
chip_gen: v7x
topology: tpu7x:2x2x1
jax: 0.10.0
libtpu: 0.0.40
codegen_flags: <defaults>
</compile_context>

<pallas_src>
import functools
from typing import NamedTuple, Optional

import jax
import jax.numpy as jnp
import numpy as np
from jax.experimental import pallas as pl
from jax.experimental.pallas import tpu as pltpu


# ----------------------------------------------------------------------------
# Affine decomposition of the 16 relaxed two-input boolean gates:
#   gate_i(a, b) = G[i,0] + G[i,1]*a + G[i,2]*b + G[i,3]*(a*b)
# ----------------------------------------------------------------------------
_GATE_AFFINE = np.array([
    [0.,  0.,  0.,  0.],   # 0  FALSE
    [0.,  0.,  0.,  1.],   # 1  A AND B
    [0.,  1.,  0., -1.],   # 2  A AND NOT B
    [0.,  1.,  0.,  0.],   # 3  A
    [0.,  0.,  1., -1.],   # 4  NOT A AND B
    [0.,  0.,  1.,  0.],   # 5  B
    [0.,  1.,  1., -2.],   # 6  XOR
    [0.,  1.,  1., -1.],   # 7  OR
    [1., -1., -1.,  1.],   # 8  NOR
    [1., -1., -1.,  2.],   # 9  XNOR
    [1.,  0., -1.,  0.],   # 10 NOT B
    [1.,  0., -1.,  1.],   # 11 A OR NOT B
    [1., -1.,  0.,  0.],   # 12 NOT A
    [1., -1.,  0.,  1.],   # 13 NOT A OR B
    [1.,  0.,  0., -1.],   # 14 NAND
    [1.,  0.,  0.,  0.],   # 15 TRUE
], dtype=np.float32)


def _round_up(x, m):
    return ((x + m - 1) // m) * m


def _cdiv(a, b):
    return -(-a // b)


# ----------------------------------------------------------------------------
# In-kernel helpers
# ----------------------------------------------------------------------------
def _exact_dot(x_f32, w_bf16):
    """x_f32 @ w_bf16 on the MXU, f32-exact when w is exactly bf16 (0/1 here).

    The f32 LHS is split into three disjoint bf16 mantissa chunks (hi/mid/lo)
    and the three bf16 matmuls are re-summed in the f32 accumulator: cost is
    3 native bf16 MXU passes (vs ~6 for a HIGHEST f32 matmul), and the one-hot
    "gather" stays bit-faithful (error ~2^-27).
    """
    hi = x_f32.astype(jnp.bfloat16)
    r1 = x_f32 - hi.astype(jnp.float32)
    mid = r1.astype(jnp.bfloat16)
    lo = (r1 - mid.astype(jnp.float32)).astype(jnp.bfloat16)
    acc = jnp.dot(hi, w_bf16, preferred_element_type=jnp.float32)
    acc = acc + jnp.dot(mid, w_bf16, preferred_element_type=jnp.float32)
    acc = acc + jnp.dot(lo, w_bf16, preferred_element_type=jnp.float32)
    return acc


def _layer_step(x, sel_bf16, co):
    """One LogicLayer: fused [A|B] one-hot gather + affine gate mixture."""
    d = x.shape[-1]
    ab = _exact_dot(x, sel_bf16)            # [TB, 2*Dmax] -> a | b in one matmul
    a = ab[:, :d]
    b = ab[:, d:]
    # 3 muls + 3 adds per element on the VPU (softmax hoisted to preprocess).
    return co[0:1, :] + co[1:2, :] * a + co[2:3, :] * b + co[3:4, :] * (a * b)


# ----------------------------------------------------------------------------
# Kernel 1: all selectors VMEM-resident, static layer loop (small/medium nets)
#   refs = (x, sel[, gm_bf16 if group > 1], out)   -- plus co between sel & gm
# ----------------------------------------------------------------------------
def _resident_kernel(*refs, num_layers, has_group_matmul):
    if has_group_matmul:
        x_ref, sel_ref, co_ref, gm_ref, o_ref = refs
    else:
        x_ref, sel_ref, co_ref, o_ref = refs
        gm_ref = None
    x = x_ref[...]                                  # [TB, Dmax] f32
    for l in range(num_layers):                     # static unroll
        x = _layer_step(x, sel_ref[l], co_ref[l])
    if gm_ref is None:
        # group == 1: GroupSum (+ 1/tau) already folded into last-layer coeffs.
        o_ref[...] = x[:, : o_ref.shape[-1]]
    else:
        o_ref[...] = _exact_dot(x, gm_ref[...])


# ----------------------------------------------------------------------------
# Kernel 2: layer index as inner "arbitrary" grid axis -> selectors streamed
# one layer at a time (auto double-buffered), activations carried in VMEM
# scratch.  Bounds VMEM for realistic widths (v7x 64 MiB).
# ----------------------------------------------------------------------------
def _streaming_kernel(*refs, has_group_matmul):
    if has_group_matmul:
        x_ref, sel_ref, co_ref, gm_ref, o_ref, act_ref = refs
    else:
        x_ref, sel_ref, co_ref, o_ref, act_ref = refs
        gm_ref = None
    l = pl.program_id(1)

    @pl.when(l == 0)
    def _():
        act_ref[...] = x_ref[...]

    y = _layer_step(act_ref[...], sel_ref[0], co_ref[0])
    act_ref[...] = y

    @pl.when(l == pl.num_programs(1) - 1)
    def _():
        if gm_ref is None:
            o_ref[...] = y[:, : o_ref.shape[-1]]
        else:
            o_ref[...] = _exact_dot(y, gm_ref[...])


# ----------------------------------------------------------------------------
# One-time parameter preprocessing (hoisted out of the per-call path)
# ----------------------------------------------------------------------------
class LogicGateNetworkParams(NamedTuple):
    sel: jax.Array            # [L, Dmax, 2*Dmax] bf16, one-hot [A | B] selectors
    coeffs: jax.Array         # [L, 8, Dmax] f32, affine gate coeffs (rows 4..7 = 0),
                              #   1/tau folded into the last layer's coefficients
    gm: Optional[jax.Array]   # [Dmax, Kpad] bf16 0/1 group-sum matrix, None if group == 1
    input_dim: int
    output_dim: int
    num_layers: int
    d_max: int
    k_pad: int


def preprocess_logic_gate_params(params, input_dim, output_dim, tau):
    """params: list of (idx_a [D], idx_b [D], weights [16, D]) per layer."""
    dims = [int(input_dim)] + [int(w.shape[1]) for (_, _, w) in params]
    num_layers = len(params)
    n_last = dims[-1]
    if n_last % output_dim != 0:
        raise ValueError(
            f"last layer width {n_last} is not divisible by output_dim {output_dim}")
    group = n_last // output_dim

    d_max = _round_up(max(dims), 128)               # lane-dense feature width
    k_pad = _round_up(output_dim, 128)              # lane-dense output width
    gate_affine = jnp.asarray(_GATE_AFFINE)         # [16, 4]
    inv_tau = 1.0 / float(tau)

    sels, coeffs = [], []
    for li, (idx_a, idx_b, w) in enumerate(params):
        d = int(w.shape[1])
        cols = jnp.arange(d, dtype=jnp.int32)
        sa = jnp.zeros((d_max, d_max), jnp.float32).at[idx_a, cols].set(1.0)
        sb = jnp.zeros((d_max, d_max), jnp.float32).at[idx_b, cols].set(1.0)
        # Fused [A | B] selector, stored in bf16 (exact for 0/1 values).
        sels.append(jnp.concatenate([sa, sb], axis=1).astype(jnp.bfloat16))
        # Softmax over the 16 gate logits -> affine coefficients, once per layer.
        probs = jax.nn.softmax(w.astype(jnp.float32), axis=0)            # [16, d]
        c = jnp.einsum('gk,gd->kd', gate_affine, probs,
                       precision=jax.lax.Precision.HIGHEST)              # [4, d]
        if li == num_layers - 1:
            c = c * inv_tau                     # fold GroupSum's 1/tau (linear)
        c = jnp.pad(c, ((0, 4), (0, d_max - d)))    # 8 sublanes, padded cols -> 0
        coeffs.append(c)

    sel = jnp.stack(sels)                            # [L, Dmax, 2*Dmax] bf16
    coeffs = jnp.stack(coeffs)                       # [L, 8, Dmax] f32

    if group == 1:
        gm = None                                    # GroupSum fully folded away
    else:
        gmat = np.zeros((d_max, k_pad), np.float32)
        for n in range(n_last):
            gmat[n, n // group] = 1.0                # pure 0/1 (tau already folded)
        gm = jnp.asarray(gmat).astype(jnp.bfloat16)

    return LogicGateNetworkParams(sel, coeffs, gm, int(input_dim), int(output_dim),
                                  num_layers, d_max, k_pad)


# ----------------------------------------------------------------------------
# pallas_call builder + forward wrapper
# ----------------------------------------------------------------------------
def _maybe_single_buffered(block_shape, index_map, single_buffer):
    if single_buffer:
        # Constant-index weight inputs: single buffer (no point double-buffering).
        return pl.BlockSpec(block_shape, index_map, pipeline_mode=pl.Buffered(1))
    return pl.BlockSpec(block_shape, index_map)


def _build_fused_call(prep, *, tb, b_pad, n_steps, streaming, single_buffer_weights):
    L, d_max, k_pad = prep.num_layers, prep.d_max, prep.k_pad
    has_gm = prep.gm is not None
    out_shape = jax.ShapeDtypeStruct((b_pad, k_pad), jnp.float32)
    cparams = pltpu.CompilerParams(
        dimension_semantics=("parallel", "arbitrary") if streaming else ("parallel",),
        vmem_limit_bytes=48 * 1024 * 1024,
    )

    if streaming:
        in_specs = [
            pl.BlockSpec((tb, d_max), lambda i, l: (i, 0)),
            pl.BlockSpec((1, d_max, 2 * d_max), lambda i, l: (l, 0, 0)),
            pl.BlockSpec((1, 8, d_max), lambda i, l: (l, 0, 0)),
        ]
        if has_gm:
            in_specs.append(_maybe_single_buffered(
                (d_max, k_pad), lambda i, l: (0, 0), single_buffer_weights))
        kern = functools.partial(_streaming_kernel, has_group_matmul=has_gm)
        return pl.pallas_call(
            kern,
            out_shape=out_shape,
            grid=(n_steps, L),
            in_specs=in_specs,
            out_specs=pl.BlockSpec((tb, k_pad), lambda i, l: (i, 0)),
            scratch_shapes=[pltpu.VMEM((tb, d_max), jnp.float32)],
            compiler_params=cparams,
        )

    in_specs = [
        pl.BlockSpec((tb, d_max), lambda i: (i, 0)),
        _maybe_single_buffered((L, d_max, 2 * d_max), lambda i: (0, 0, 0),
                               single_buffer_weights),
        _maybe_single_buffered((L, 8, d_max), lambda i: (0, 0, 0),
                               single_buffer_weights),
    ]
    if has_gm:
        in_specs.append(_maybe_single_buffered(
            (d_max, k_pad), lambda i: (0, 0), single_buffer_weights))
    kern = functools.partial(_resident_kernel, num_layers=L, has_group_matmul=has_gm)
    return pl.pallas_call(
        kern,
        out_shape=out_shape,
        grid=(n_steps,),
        in_specs=in_specs,
        out_specs=pl.BlockSpec((tb, k_pad), lambda i: (i, 0)),
        compiler_params=cparams,
    )


def logic_gate_network_forward(x, prep, *, batch_tile=256, force_streaming=None,
                               resident_selector_budget_bytes=24 * 1024 * 1024):
    """Forward pass: all LogicLayers + GroupSum in a single pallas_call."""
    B, in_dim = x.shape
    if in_dim != prep.input_dim:
        raise ValueError(f"expected input_dim {prep.input_dim}, got {in_dim}")
    d_max = prep.d_max

    # Batch padding / tiling; >= 2 grid steps whenever the padded batch allows,
    # so the "parallel" batch axis actually uses both TensorCores on v7x.
    b_pad = _round_up(B, 8)
    n_steps = max(_cdiv(b_pad, batch_tile), 2 if b_pad >= 16 else 1)
    tb = _round_up(_cdiv(b_pad, n_steps), 8)
    b_pad = _round_up(b_pad, tb)
    n_steps = b_pad // tb

    x_p = jnp.zeros((b_pad, d_max), jnp.float32).at[:B, :in_dim].set(
        x.astype(jnp.float32))

    if force_streaming is None:
        sel_bytes = prep.sel.size * prep.sel.dtype.itemsize
        streaming = sel_bytes > resident_selector_budget_bytes
    else:
        streaming = bool(force_streaming)

    args = [x_p, prep.sel, prep.coeffs]
    if prep.gm is not None:
        args.append(prep.gm)

    try:
        call = _build_fused_call(prep, tb=tb, b_pad=b_pad, n_steps=n_steps,
                                 streaming=streaming, single_buffer_weights=True)
        out = call(*args)
    except Exception:
        # pl.Buffered(1) single-buffering may be unsupported on this jax/Mosaic
        # version -- fall back to default (double) buffering, same semantics.
        call = _build_fused_call(prep, tb=tb, b_pad=b_pad, n_steps=n_steps,
                                 streaming=streaming, single_buffer_weights=False)
        out = call(*args)

    return out[:B, :prep.output_dim]


# ----------------------------------------------------------------------------
# Pure-JAX reference (original 16-gate softmax mixture) for correctness check
# ----------------------------------------------------------------------------
def _ref_forward(x, params, output_dim, tau):
    x = x.astype(jnp.float32)
    for idx_a, idx_b, w in params:
        a = jnp.take(x, idx_a, axis=1)
        b = jnp.take(x, idx_b, axis=1)
        p = jax.nn.softmax(w.astype(jnp.float32), axis=0)        # [16, D]
        ab = a * b
        ops = jnp.stack([
            jnp.zeros_like(ab), ab, a - ab, a, b - ab, b,
            a + b - 2 * ab, a + b - ab, 1 - (a + b - ab),
            1 - (a + b - 2 * ab), 1 - b, 1 - b + ab,
            1 - a, 1 - a + ab, 1 - ab, jnp.ones_like(ab),
        ])                                                       # [16, B, D]
        x = jnp.einsum('gd,gbd->bd', p, ops,
                       precision=jax.lax.Precision.HIGHEST)
    B, N = x.shape
    return jnp.sum(x.reshape(B, output_dim, N // output_dim), axis=-1) / tau


# ----------------------------------------------------------------------------
# Deterministic parameter construction (synthetic; no checkpoint load)
# ----------------------------------------------------------------------------
def make_params(key, input_dim, hidden_dims, last_layer_dim):
    layer_dims = list(hidden_dims) + [last_layer_dim]
    params = []
    prev = input_dim
    for dim in layer_dims:
        key, k_a, k_b, k_w = jax.random.split(key, 4)
        idx_a = jax.random.randint(k_a, (dim,), 0, prev, dtype=jnp.int32)
        idx_b = jax.random.randint(k_b, (dim,), 0, prev, dtype=jnp.int32)
        # torch weights are [dim, 16]; we store the transpose [16, dim]
        w = jax.random.normal(k_w, (16, dim), dtype=jnp.float32)
        params.append((idx_a, idx_b, w))
        prev = dim
    return params


if __name__ == "__main__":
    # Small config consistent with the module's forward signature.
    batch = 20
    input_dim = 32
    hidden_dims = [64, 48]
    output_dim = 8
    tau = 2.0

    key = jax.random.PRNGKey(0)
    key, kx = jax.random.split(key)
    x = jax.random.uniform(kx, (batch, input_dim), dtype=jnp.float32)

    # --- module-exact config: last layer has output_dim neurons (group == 1) ---
    params = make_params(key, input_dim, hidden_dims, output_dim)
    prep = preprocess_logic_gate_params(params, input_dim, output_dim, tau)
    ref = jax.block_until_ready(_ref_forward(x, params, output_dim, tau))

    # Resident-selector kernel.
    out_res = jax.block_until_ready(
        logic_gate_network_forward(x, prep, force_streaming=False))
    assert out_res.shape == (batch, output_dim), out_res.shape
    np.testing.assert_allclose(np.asarray(out_res), np.asarray(ref),
                               rtol=1e-5, atol=1e-5)

    # Per-layer streaming kernel (used automatically for large widths).
    out_str = jax.block_until_ready(
        logic_gate_network_forward(x, prep, force_streaming=True))
    np.testing.assert_allclose(np.asarray(out_str), np.asarray(ref),
                               rtol=1e-5, atol=1e-5)

    # --- grouped reduction path (GroupSum with group > 1) ---
    out_dim2, neurons_per_output = 4, 4
    params2 = make_params(jax.random.PRNGKey(1), input_dim, [64],
                          out_dim2 * neurons_per_output)
    prep2 = preprocess_logic_gate_params(params2, input_dim, out_dim2, tau)
    ref2 = jax.block_until_ready(_ref_forward(x, params2, out_dim2, tau))
    out2 = jax.block_until_ready(logic_gate_network_forward(x, prep2))
    assert out2.shape == (batch, out_dim2), out2.shape
    np.testing.assert_allclose(np.asarray(out2), np.asarray(ref2),
                               rtol=1e-5, atol=1e-5)

    print("KERNEL_OK")
</pallas_src>

<mosaic_0001>
module attributes {stable_mosaic.version = 11 : i64} {
  func.func @_resident_kernel(%arg0: i32, %arg1: memref<16x128xf32, #tpu.memory_space<vmem>>, %arg2: memref<3x128x256xbf16, #tpu.memory_space<vmem>>, %arg3: memref<3x8x128xf32, #tpu.memory_space<vmem>>, %arg4: memref<16x128xf32, #tpu.memory_space<vmem>>) attributes {dimension_semantics = [#tpu.dimension_semantics<parallel>], iteration_bounds = array<i64: 2>, scalar_prefetch = 0 : i64, scratch_operands = 0 : i64, tpu.core_type = #tpu.core_type<tc>, window_params = [{transform_indices = @transform_0, window_bounds = array<i64: 16, 128>}, {pipeline_mode = #tpu.pipeline_mode<synchronous>, transform_indices = @transform_1, window_bounds = array<i64: 3, 128, 256>}, {pipeline_mode = #tpu.pipeline_mode<synchronous>, transform_indices = @transform_2, window_bounds = array<i64: 3, 8, 128>}, {transform_indices = @transform_3, window_bounds = array<i64: 16, 128>}]} {
    %c0 = arith.constant 0 : index
    %c0_0 = arith.constant 0 : index
    %0 = vector.load %arg1[%c0, %c0_0] : memref<16x128xf32, #tpu.memory_space<vmem>>, vector<16x128xf32>
    %c0_1 = arith.constant 0 : index
    %c0_2 = arith.constant 0 : index
    %c0_3 = arith.constant 0 : index
    %1 = vector.load %arg2[%c0_1, %c0_2, %c0_3] : memref<3x128x256xbf16, #tpu.memory_space<vmem>>, vector<1x128x256xbf16>
    %2 = vector.shape_cast %1 : vector<1x128x256xbf16> to vector<128x256xbf16>
    %c0_4 = arith.constant 0 : index
    %c0_5 = arith.constant 0 : index
    %c0_6 = arith.constant 0 : index
    %3 = vector.load %arg3[%c0_4, %c0_5, %c0_6] : memref<3x8x128xf32, #tpu.memory_space<vmem>>, vector<1x8x128xf32>
    %4 = vector.shape_cast %3 : vector<1x8x128xf32> to vector<8x128xf32>
    %5 = arith.truncf %0 : vector<16x128xf32> to vector<16x128xbf16>
    %6 = arith.extf %5 : vector<16x128xbf16> to vector<16x128xf32>
    %7 = arith.subf %0, %6 : vector<16x128xf32>
    %8 = arith.truncf %7 : vector<16x128xf32> to vector<16x128xbf16>
    %9 = arith.extf %8 : vector<16x128xbf16> to vector<16x128xf32>
    %10 = arith.subf %7, %9 : vector<16x128xf32>
    %11 = arith.truncf %10 : vector<16x128xf32> to vector<16x128xbf16>
    %cst = arith.constant dense<0.000000e+00> : vector<16x256xf32>
    %12 = tpu.matmul %5, %2, %cst {dimension_numbers = #tpu.dot_dimension_numbers<[1], [0], [0], [1], [0, 0, 1, 1], [], []>} : vector<16x128xbf16>, vector<128x256xbf16>, vector<16x256xf32> -> vector<16x256xf32>
    %cst_7 = arith.constant dense<0.000000e+00> : vector<16x256xf32>
    %13 = tpu.matmul %8, %2, %cst_7 {dimension_numbers = #tpu.dot_dimension_numbers<[1], [0], [0], [1], [0, 0, 1, 1], [], []>} : vector<16x128xbf16>, vector<128x256xbf16>, vector<16x256xf32> -> vector<16x256xf32>
    %14 = arith.addf %12, %13 : vector<16x256xf32>
    %cst_8 = arith.constant dense<0.000000e+00> : vector<16x256xf32>
    %15 = tpu.matmul %11, %2, %cst_8 {dimension_numbers = #tpu.dot_dimension_numbers<[1], [0], [0], [1], [0, 0, 1, 1], [], []>} : vector<16x128xbf16>, vector<128x256xbf16>, vector<16x256xf32> -> vector<16x256xf32>
    %16 = arith.addf %14, %15 : vector<16x256xf32>
    %17 = vector.extract_strided_slice %16 {offsets = [0, 0], sizes = [16, 128], strides = [1, 1]} : vector<16x256xf32> to vector<16x128xf32>
    %18 = vector.extract_strided_slice %16 {offsets = [0, 128], sizes = [16, 128], strides = [1, 1]} : vector<16x256xf32> to vector<16x128xf32>
    %19 = vector.extract_strided_slice %4 {offsets = [0, 0], sizes = [1, 128], strides = [1, 1]} : vector<8x128xf32> to vector<1x128xf32>
    %20 = vector.extract_strided_slice %4 {offsets = [1, 0], sizes = [1, 128], strides = [1, 1]} : vector<8x128xf32> to vector<1x128xf32>
    %21 = vector.broadcast %20 : vector<1x128xf32> to vector<16x128xf32>
    %22 = arith.mulf %21, %17 : vector<16x128xf32>
    %23 = vector.broadcast %19 : vector<1x128xf32> to vector<16x128xf32>
    %24 = arith.addf %23, %22 : vector<16x128xf32>
    %25 = vector.extract_strided_slice %4 {offsets = [2, 0], sizes = [1, 128], strides = [1, 1]} : vector<8x128xf32> to vector<1x128xf32>
    %26 = vector.broadcast %25 : vector<1x128xf32> to vector<16x128xf32>
    %27 = arith.mulf %26, %18 : vector<16x128xf32>
    %28 = arith.addf %24, %27 : vector<16x128xf32>
    %29 = vector.extract_strided_slice %4 {offsets = [3, 0], sizes = [1, 128], strides = [1, 1]} : vector<8x128xf32> to vector<1x128xf32>
    %30 = arith.mulf %17, %18 : vector<16x128xf32>
    %31 = vector.broadcast %29 : vector<1x128xf32> to vector<16x128xf32>
    %32 = arith.mulf %31, %30 : vector<16x128xf32>
    %33 = arith.addf %28, %32 : vector<16x128xf32>
    %c1 = arith.constant 1 : index
    %c0_9 = arith.constant 0 : index
    %c0_10 = arith.constant 0 : index
    %34 = vector.load %arg2[%c1, %c0_9, %c0_10] : memref<3x128x256xbf16, #tpu.memory_space<vmem>>, vector<1x128x256xbf16>
    %35 = vector.shape_cast %34 : vector<1x128x256xbf16> to vector<128x256xbf16>
    %c1_11 = arith.constant 1 : index
    %c0_12 = arith.constant 0 : index
    %c0_13 = arith.constant 0 : index
    %36 = vector.load %arg3[%c1_11, %c0_12, %c0_13] : memref<3x8x128xf32, #tpu.memory_space<vmem>>, vector<1x8x128xf32>
    %37 = vector.shape_cast %36 : vector<1x8x128xf32> to vector<8x128xf32>
    %38 = arith.truncf %33 : vector<16x128xf32> to vector<16x128xbf16>
    %39 = arith.extf %38 : vector<16x128xbf16> to vector<16x128xf32>
    %40 = arith.subf %33, %39 : vector<16x128xf32>
    %41 = arith.truncf %40 : vector<16x128xf32> to vector<16x128xbf16>
    %42 = arith.extf %41 : vector<16x128xbf16> to vector<16x128xf32>
    %43 = arith.subf %40, %42 : vector<16x128xf32>
    %44 = arith.truncf %43 : vector<16x128xf32> to vector<16x128xbf16>
    %cst_14 = arith.constant dense<0.000000e+00> : vector<16x256xf32>
    %45 = tpu.matmul %38, %35, %cst_14 {dimension_numbers = #tpu.dot_dimension_numbers<[1], [0], [0], [1], [0, 0, 1, 1], [], []>} : vector<16x128xbf16>, vector<128x256xbf16>, vector<16x256xf32> -> vector<16x256xf32>
    %cst_15 = arith.constant dense<0.000000e+00> : vector<16x256xf32>
    %46 = tpu.matmul %41, %35, %cst_15 {dimension_numbers = #tpu.dot_dimension_numbers<[1], [0], [0], [1], [0, 0, 1, 1], [], []>} : vector<16x128xbf16>, vector<128x256xbf16>, vector<16x256xf32> -> vector<16x256xf32>
    %47 = arith.addf %45, %46 : vector<16x256xf32>
    %cst_16 = arith.constant dense<0.000000e+00> : vector<16x256xf32>
    %48 = tpu.matmul %44, %35, %cst_16 {dimension_numbers = #tpu.dot_dimension_numbers<[1], [0], [0], [1], [0, 0, 1, 1], [], []>} : vector<16x128xbf16>, vector<128x256xbf16>, vector<16x256xf32> -> vector<16x256xf32>
    %49 = arith.addf %47, %48 : vector<16x256xf32>
    %50 = vector.extract_strided_slice %49 {offsets = [0, 0], sizes = [16, 128], strides = [1, 1]} : vector<16x256xf32> to vector<16x128xf32>
    %51 = vector.extract_strided_slice %49 {offsets = [0, 128], sizes = [16, 128], strides = [1, 1]} : vector<16x256xf32> to vector<16x128xf32>
    %52 = vector.extract_strided_slice %37 {offsets = [0, 0], sizes = [1, 128], strides = [1, 1]} : vector<8x128xf32> to vector<1x128xf32>
    %53 = vector.extract_strided_slice %37 {offsets = [1, 0], sizes = [1, 128], strides = [1, 1]} : vector<8x128xf32> to vector<1x128xf32>
    %54 = vector.broadcast %53 : vector<1x128xf32> to vector<16x128xf32>
    %55 = arith.mulf %54, %50 : vector<16x128xf32>
    %56 = vector.broadcast %52 : vector<1x128xf32> to vector<16x128xf32>
    %57 = arith.addf %56, %55 : vector<16x128xf32>
    %58 = vector.extract_strided_slice %37 {offsets = [2, 0], sizes = [1, 128], strides = [1, 1]} : vector<8x128xf32> to vector<1x128xf32>
    %59 = vector.broadcast %58 : vector<1x128xf32> to vector<16x128xf32>
    %60 = arith.mulf %59, %51 : vector<16x128xf32>
    %61 = arith.addf %57, %60 : vector<16x128xf32>
    %62 = vector.extract_strided_slice %37 {offsets = [3, 0], sizes = [1, 128], strides = [1, 1]} : vector<8x128xf32> to vector<1x128xf32>
    %63 = arith.mulf %50, %51 : vector<16x128xf32>
    %64 = vector.broadcast %62 : vector<1x128xf32> to vector<16x128xf32>
    %65 = arith.mulf %64, %63 : vector<16x128xf32>
    %66 = arith.addf %61, %65 : vector<16x128xf32>
    %c2 = arith.constant 2 : index
    %c0_17 = arith.constant 0 : index
    %c0_18 = arith.constant 0 : index
    %67 = vector.load %arg2[%c2, %c0_17, %c0_18] : memref<3x128x256xbf16, #tpu.memory_space<vmem>>, vector<1x128x256xbf16>
    %68 = vector.shape_cast %67 : vector<1x128x256xbf16> to vector<128x256xbf16>
    %c2_19 = arith.constant 2 : index
    %c0_20 = arith.constant 0 : index
    %c0_21 = arith.constant 0 : index
    %69 = vector.load %arg3[%c2_19, %c0_20, %c0_21] : memref<3x8x128xf32, #tpu.memory_space<vmem>>, vector<1x8x128xf32>
    %70 = vector.shape_cast %69 : vector<1x8x128xf32> to vector<8x128xf32>
    %71 = arith.truncf %66 : vector<16x128xf32> to vector<16x128xbf16>
    %72 = arith.extf %71 : vector<16x128xbf16> to vector<16x128xf32>
    %73 = arith.subf %66, %72 : vector<16x128xf32>
    %74 = arith.truncf %73 : vector<16x128xf32> to vector<16x128xbf16>
    %75 = arith.extf %74 : vector<16x128xbf16> to vector<16x128xf32>
    %76 = arith.subf %73, %75 : vector<16x128xf32>
    %77 = arith.truncf %76 : vector<16x128xf32> to vector<16x128xbf16>
    %cst_22 = arith.constant dense<0.000000e+00> : vector<16x256xf32>
    %78 = tpu.matmul %71, %68, %cst_22 {dimension_numbers = #tpu.dot_dimension_numbers<[1], [0], [0], [1], [0, 0, 1, 1], [], []>} : vector<16x128xbf16>, vector<128x256xbf16>, vector<16x256xf32> -> vector<16x256xf32>
    %cst_23 = arith.constant dense<0.000000e+00> : vector<16x256xf32>
    %79 = tpu.matmul %74, %68, %cst_23 {dimension_numbers = #tpu.dot_dimension_numbers<[1], [0], [0], [1], [0, 0, 1, 1], [], []>} : vector<16x128xbf16>, vector<128x256xbf16>, vector<16x256xf32> -> vector<16x256xf32>
    %80 = arith.addf %78, %79 : vector<16x256xf32>
    %cst_24 = arith.constant dense<0.000000e+00> : vector<16x256xf32>
    %81 = tpu.matmul %77, %68, %cst_24 {dimension_numbers = #tpu.dot_dimension_numbers<[1], [0], [0], [1], [0, 0, 1, 1], [], []>} : vector<16x128xbf16>, vector<128x256xbf16>, vector<16x256xf32> -> vector<16x256xf32>
    %82 = arith.addf %80, %81 : vector<16x256xf32>
    %83 = vector.extract_strided_slice %82 {offsets = [0, 0], sizes = [16, 128], strides = [1, 1]} : vector<16x256xf32> to vector<16x128xf32>
    %84 = vector.extract_strided_slice %82 {offsets = [0, 128], sizes = [16, 128], strides = [1, 1]} : vector<16x256xf32> to vector<16x128xf32>
    %85 = vector.extract_strided_slice %70 {offsets = [0, 0], sizes = [1, 128], strides = [1, 1]} : vector<8x128xf32> to vector<1x128xf32>
    %86 = vector.extract_strided_slice %70 {offsets = [1, 0], sizes = [1, 128], strides = [1, 1]} : vector<8x128xf32> to vector<1x128xf32>
    %87 = vector.broadcast %86 : vector<1x128xf32> to vector<16x128xf32>
    %88 = arith.mulf %87, %83 : vector<16x128xf32>
    %89 = vector.broadcast %85 : vector<1x128xf32> to vector<16x128xf32>
    %90 = arith.addf %89, %88 : vector<16x128xf32>
    %91 = vector.extract_strided_slice %70 {offsets = [2, 0], sizes = [1, 128], strides = [1, 1]} : vector<8x128xf32> to vector<1x128xf32>
    %92 = vector.broadcast %91 : vector<1x128xf32> to vector<16x128xf32>
    %93 = arith.mulf %92, %84 : vector<16x128xf32>
    %94 = arith.addf %90, %93 : vector<16x128xf32>
    %95 = vector.extract_strided_slice %70 {offsets = [3, 0], sizes = [1, 128], strides = [1, 1]} : vector<8x128xf32> to vector<1x128xf32>
    %96 = arith.mulf %83, %84 : vector<16x128xf32>
    %97 = vector.broadcast %95 : vector<1x128xf32> to vector<16x128xf32>
    %98 = arith.mulf %97, %96 : vector<16x128xf32>
    %99 = arith.addf %94, %98 : vector<16x128xf32>
    %c0_25 = arith.constant 0 : index
    %c0_26 = arith.constant 0 : index
    %100 = vector.load %arg4[%c0_25, %c0_26] : memref<16x128xf32, #tpu.memory_space<vmem>>, vector<16x128xf32>
    tpu.vector_store %arg4[%c0_25, %c0_26], %99 {strides = array<i32>} : memref<16x128xf32, #tpu.memory_space<vmem>>, vector<16x128xf32>,
    return
  }
  func.func @transform_0(%arg0: i32) -> (i32, i32) {
    %c0_i32 = arith.constant 0 : i32
    %c0_i32_0 = arith.constant 0 : i32
    return %arg0, %c0_i32 : i32, i32
  }
  func.func @transform_1(%arg0: i32) -> (i32, i32, i32) {
    %c0_i32 = arith.constant 0 : i32
    %c0_i32_0 = arith.constant 0 : i32
    %c0_i32_1 = arith.constant 0 : i32
    %c0_i32_2 = arith.constant 0 : i32
    return %c0_i32, %c0_i32_0, %c0_i32_1 : i32, i32, i32
  }
  func.func @transform_2(%arg0: i32) -> (i32, i32, i32) {
    %c0_i32 = arith.constant 0 : i32
    %c0_i32_0 = arith.constant 0 : i32
    %c0_i32_1 = arith.constant 0 : i32
    %c0_i32_2 = arith.constant 0 : i32
    return %c0_i32, %c0_i32_0, %c0_i32_1 : i32, i32, i32
  }
  func.func @transform_3(%arg0: i32) -> (i32, i32) {
    %c0_i32 = arith.constant 0 : i32
    %c0_i32_0 = arith.constant 0 : i32
    return %arg0, %c0_i32 : i32, i32
  }
}

module attributes {stable_mosaic.version = 11 : i64} {
  func.func @_resident_kernel(%arg0: i32, %arg1: memref<16x128xf32, #tpu.memory_space<vmem>>, %arg2: memref<3x128x256xbf16, #tpu.memory_space<vmem>>, %arg3: memref<3x8x128xf32, #tpu.memory_space<vmem>>, %arg4: memref<16x128xf32, #tpu.memory_space<vmem>>) attributes {dimension_semantics = [#tpu.dimension_semantics<parallel>], iteration_bounds = array<i64: 2>, scalar_prefetch = 0 : i64, scratch_operands = 0 : i64, tpu.core_type = #tpu.core_type<tc>, window_params = [{transform_indices = @transform_0, window_bounds = array<i64: 16, 128>}, {pipeline_mode = #tpu.pipeline_mode<synchronous>, transform_indices = @transform_1, window_bounds = array<i64: 3, 128, 256>}, {pipeline_mode = #tpu.pipeline_mode<synchronous>, transform_indices = @transform_2, window_bounds = array<i64: 3, 8, 128>}, {transform_indices = @transform_3, window_bounds = array<i64: 16, 128>}]} {
    %c0 = arith.constant 0 : index
    %c0_0 = arith.constant 0 : index
    %0 = vector.load %arg1[%c0, %c0_0] : memref<16x128xf32, #tpu.memory_space<vmem>>, vector<16x128xf32>
    %c0_1 = arith.constant 0 : index
    %c0_2 = arith.constant 0 : index
    %c0_3 = arith.constant 0 : index
    %1 = vector.load %arg2[%c0_1, %c0_2, %c0_3] : memref<3x128x256xbf16, #tpu.memory_space<vmem>>, vector<1x128x256xbf16>
    %2 = vector.shape_cast %1 : vector<1x128x256xbf16> to vector<128x256xbf16>
    %c0_4 = arith.constant 0 : index
    %c0_5 = arith.constant 0 : index
    %c0_6 = arith.constant 0 : index
    %3 = vector.load %arg3[%c0_4, %c0_5, %c0_6] : memref<3x8x128xf32, #tpu.memory_space<vmem>>, vector<1x8x128xf32>
    %4 = vector.shape_cast %3 : vector<1x8x128xf32> to vector<8x128xf32>
    %5 = arith.truncf %0 : vector<16x128xf32> to vector<16x128xbf16>
    %6 = arith.extf %5 : vector<16x128xbf16> to vector<16x128xf32>
    %7 = arith.subf %0, %6 : vector<16x128xf32>
    %8 = arith.truncf %7 : vector<16x128xf32> to vector<16x128xbf16>
    %9 = arith.extf %8 : vector<16x128xbf16> to vector<16x128xf32>
    %10 = arith.subf %7, %9 : vector<16x128xf32>
    %11 = arith.truncf %10 : vector<16x128xf32> to vector<16x128xbf16>
    %cst = arith.constant dense<0.000000e+00> : vector<16x256xf32>
    %12 = tpu.matmul %5, %2, %cst {dimension_numbers = #tpu.dot_dimension_numbers<[1], [0], [0], [1], [0, 0, 1, 1], [], []>} : vector<16x128xbf16>, vector<128x256xbf16>, vector<16x256xf32> -> vector<16x256xf32>
    %cst_7 = arith.constant dense<0.000000e+00> : vector<16x256xf32>
    %13 = tpu.matmul %8, %2, %cst_7 {dimension_numbers = #tpu.dot_dimension_numbers<[1], [0], [0], [1], [0, 0, 1, 1], [], []>} : vector<16x128xbf16>, vector<128x256xbf16>, vector<16x256xf32> -> vector<16x256xf32>
    %14 = arith.addf %12, %13 : vector<16x256xf32>
    %cst_8 = arith.constant dense<0.000000e+00> : vector<16x256xf32>
    %15 = tpu.matmul %11, %2, %cst_8 {dimension_numbers = #tpu.dot_dimension_numbers<[1], [0], [0], [1], [0, 0, 1, 1], [], []>} : vector<16x128xbf16>, vector<128x256xbf16>, vector<16x256xf32> -> vector<16x256xf32>
    %16 = arith.addf %14, %15 : vector<16x256xf32>
    %17 = vector.extract_strided_slice %16 {offsets = [0, 0], sizes = [16, 128], strides = [1, 1]} : vector<16x256xf32> to vector<16x128xf32>
    %18 = vector.extract_strided_slice %16 {offsets = [0, 128], sizes = [16, 128], strides = [1, 1]} : vector<16x256xf32> to vector<16x128xf32>
    %19 = vector.extract_strided_slice %4 {offsets = [0, 0], sizes = [1, 128], strides = [1, 1]} : vector<8x128xf32> to vector<1x128xf32>
    %20 = vector.extract_strided_slice %4 {offsets = [1, 0], sizes = [1, 128], strides = [1, 1]} : vector<8x128xf32> to vector<1x128xf32>
    %21 = vector.broadcast %20 : vector<1x128xf32> to vector<16x128xf32>
    %22 = arith.mulf %21, %17 : vector<16x128xf32>
    %23 = vector.broadcast %19 : vector<1x128xf32> to vector<16x128xf32>
    %24 = arith.addf %23, %22 : vector<16x128xf32>
    %25 = vector.extract_strided_slice %4 {offsets = [2, 0], sizes = [1, 128], strides = [1, 1]} : vector<8x128xf32> to vector<1x128xf32>
    %26 = vector.broadcast %25 : vector<1x128xf32> to vector<16x128xf32>
    %27 = arith.mulf %26, %18 : vector<16x128xf32>
    %28 = arith.addf %24, %27 : vector<16x128xf32>
    %29 = vector.extract_strided_slice %4 {offsets = [3, 0], sizes = [1, 128], strides = [1, 1]} : vector<8x128xf32> to vector<1x128xf32>
    %30 = arith.mulf %17, %18 : vector<16x128xf32>
    %31 = vector.broadcast %29 : vector<1x128xf32> to vector<16x128xf32>
    %32 = arith.mulf %31, %30 : vector<16x128xf32>
    %33 = arith.addf %28, %32 : vector<16x128xf32>
    %c1 = arith.constant 1 : index
    %c0_9 = arith.constant 0 : index
    %c0_10 = arith.constant 0 : index
    %34 = vector.load %arg2[%c1, %c0_9, %c0_10] : memref<3x128x256xbf16, #tpu.memory_space<vmem>>, vector<1x128x256xbf16>
    %35 = vector.shape_cast %34 : vector<1x128x256xbf16> to vector<128x256xbf16>
    %c1_11 = arith.constant 1 : index
    %c0_12 = arith.constant 0 : index
    %c0_13 = arith.constant 0 : index
    %36 = vector.load %arg3[%c1_11, %c0_12, %c0_13] : memref<3x8x128xf32, #tpu.memory_space<vmem>>, vector<1x8x128xf32>
    %37 = vector.shape_cast %36 : vector<1x8x128xf32> to vector<8x128xf32>
    %38 = arith.truncf %33 : vector<16x128xf32> to vector<16x128xbf16>
    %39 = arith.extf %38 : vector<16x128xbf16> to vector<16x128xf32>
    %40 = arith.subf %33, %39 : vector<16x128xf32>
    %41 = arith.truncf %40 : vector<16x128xf32> to vector<16x128xbf16>
    %42 = arith.extf %41 : vector<16x128xbf16> to vector<16x128xf32>
    %43 = arith.subf %40, %42 : vector<16x128xf32>
    %44 = arith.truncf %43 : vector<16x128xf32> to vector<16x128xbf16>
    %cst_14 = arith.constant dense<0.000000e+00> : vector<16x256xf32>
    %45 = tpu.matmul %38, %35, %cst_14 {dimension_numbers = #tpu.dot_dimension_numbers<[1], [0], [0], [1], [0, 0, 1, 1], [], []>} : vector<16x128xbf16>, vector<128x256xbf16>, vector<16x256xf32> -> vector<16x256xf32>
    %cst_15 = arith.constant dense<0.000000e+00> : vector<16x256xf32>
    %46 = tpu.matmul %41, %35, %cst_15 {dimension_numbers = #tpu.dot_dimension_numbers<[1], [0], [0], [1], [0, 0, 1, 1], [], []>} : vector<16x128xbf16>, vector<128x256xbf16>, vector<16x256xf32> -> vector<16x256xf32>
    %47 = arith.addf %45, %46 : vector<16x256xf32>
    %cst_16 = arith.constant dense<0.000000e+00> : vector<16x256xf32>
    %48 = tpu.matmul %44, %35, %cst_16 {dimension_numbers = #tpu.dot_dimension_numbers<[1], [0], [0], [1], [0, 0, 1, 1], [], []>} : vector<16x128xbf16>, vector<128x256xbf16>, vector<16x256xf32> -> vector<16x256xf32>
    %49 = arith.addf %47, %48 : vector<16x256xf32>
    %50 = vector.extract_strided_slice %49 {offsets = [0, 0], sizes = [16, 128], strides = [1, 1]} : vector<16x256xf32> to vector<16x128xf32>
    %51 = vector.extract_strided_slice %49 {offsets = [0, 128], sizes = [16, 128], strides = [1, 1]} : vector<16x256xf32> to vector<16x128xf32>
    %52 = vector.extract_strided_slice %37 {offsets = [0, 0], sizes = [1, 128], strides = [1, 1]} : vector<8x128xf32> to vector<1x128xf32>
    %53 = vector.extract_strided_slice %37 {offsets = [1, 0], sizes = [1, 128], strides = [1, 1]} : vector<8x128xf32> to vector<1x128xf32>
    %54 = vector.broadcast %53 : vector<1x128xf32> to vector<16x128xf32>
    %55 = arith.mulf %54, %50 : vector<16x128xf32>
    %56 = vector.broadcast %52 : vector<1x128xf32> to vector<16x128xf32>
    %57 = arith.addf %56, %55 : vector<16x128xf32>
    %58 = vector.extract_strided_slice %37 {offsets = [2, 0], sizes = [1, 128], strides = [1, 1]} : vector<8x128xf32> to vector<1x128xf32>
    %59 = vector.broadcast %58 : vector<1x128xf32> to vector<16x128xf32>
    %60 = arith.mulf %59, %51 : vector<16x128xf32>
    %61 = arith.addf %57, %60 : vector<16x128xf32>
    %62 = vector.extract_strided_slice %37 {offsets = [3, 0], sizes = [1, 128], strides = [1, 1]} : vector<8x128xf32> to vector<1x128xf32>
    %63 = arith.mulf %50, %51 : vector<16x128xf32>
    %64 = vector.broadcast %62 : vector<1x128xf32> to vector<16x128xf32>
    %65 = arith.mulf %64, %63 : vector<16x128xf32>
    %66 = arith.addf %61, %65 : vector<16x128xf32>
    %c2 = arith.constant 2 : index
    %c0_17 = arith.constant 0 : index
    %c0_18 = arith.constant 0 : index
    %67 = vector.load %arg2[%c2, %c0_17, %c0_18] : memref<3x128x256xbf16, #tpu.memory_space<vmem>>, vector<1x128x256xbf16>
    %68 = vector.shape_cast %67 : vector<1x128x256xbf16> to vector<128x256xbf16>
    %c2_19 = arith.constant 2 : index
    %c0_20 = arith.constant 0 : index
    %c0_21 = arith.constant 0 : index
    %69 = vector.load %arg3[%c2_19, %c0_20, %c0_21] : memref<3x8x128xf32, #tpu.memory_space<vmem>>, vector<1x8x128xf32>
    %70 = vector.shape_cast %69 : vector<1x8x128xf32> to vector<8x128xf32>
    %71 = arith.truncf %66 : vector<16x128xf32> to vector<16x128xbf16>
    %72 = arith.extf %71 : vector<16x128xbf16> to vector<16x128xf32>
    %73 = arith.subf %66, %72 : vector<16x128xf32>
    %74 = arith.truncf %73 : vector<16x128xf32> to vector<16x128xbf16>
    %75 = arith.extf %74 : vector<16x128xbf16> to vector<16x128xf32>
    %76 = arith.subf %73, %75 : vector<16x128xf32>
    %77 = arith.truncf %76 : vector<16x128xf32> to vector<16x128xbf16>
    %cst_22 = arith.constant dense<0.000000e+00> : vector<16x256xf32>
    %78 = tpu.matmul %71, %68, %cst_22 {dimension_numbers = #tpu.dot_dimension_numbers<[1], [0], [0], [1], [0, 0, 1, 1], [], []>} : vector<16x128xbf16>, vector<128x256xbf16>, vector<16x256xf32> -> vector<16x256xf32>
    %cst_23 = arith.constant dense<0.000000e+00> : vector<16x256xf32>
    %79 = tpu.matmul %74, %68, %cst_23 {dimension_numbers = #tpu.dot_dimension_numbers<[1], [0], [0], [1], [0, 0, 1, 1], [], []>} : vector<16x128xbf16>, vector<128x256xbf16>, vector<16x256xf32> -> vector<16x256xf32>
    %80 = arith.addf %78, %79 : vector<16x256xf32>
    %cst_24 = arith.constant dense<0.000000e+00> : vector<16x256xf32>
    %81 = tpu.matmul %77, %68, %cst_24 {dimension_numbers = #tpu.dot_dimension_numbers<[1], [0], [0], [1], [0, 0, 1, 1], [], []>} : vector<16x128xbf16>, vector<128x256xbf16>, vector<16x256xf32> -> vector<16x256xf32>
    %82 = arith.addf %80, %81 : vector<16x256xf32>
    %83 = vector.extract_strided_slice %82 {offsets = [0, 0], sizes = [16, 128], strides = [1, 1]} : vector<16x256xf32> to vector<16x128xf32>
    %84 = vector.extract_strided_slice %82 {offsets = [0, 128], sizes = [16, 128], strides = [1, 1]} : vector<16x256xf32> to vector<16x128xf32>
    %85 = vector.extract_strided_slice %70 {offsets = [0, 0], sizes = [1, 128], strides = [1, 1]} : vector<8x128xf32> to vector<1x128xf32>
    %86 = vector.extract_strided_slice %70 {offsets = [1, 0], sizes = [1, 128], strides = [1, 1]} : vector<8x128xf32> to vector<1x128xf32>
    %87 = vector.broadcast %86 : vector<1x128xf32> to vector<16x128xf32>
    %88 = arith.mulf %87, %83 : vector<16x128xf32>
    %89 = vector.broadcast %85 : vector<1x128xf32> to vector<16x128xf32>
    %90 = arith.addf %89, %88 : vector<16x128xf32>
    %91 = vector.extract_strided_slice %70 {offsets = [2, 0], sizes = [1, 128], strides = [1, 1]} : vector<8x128xf32> to vector<1x128xf32>
    %92 = vector.broadcast %91 : vector<1x128xf32> to vector<16x128xf32>
    %93 = arith.mulf %92, %84 : vector<16x128xf32>
    %94 = arith.addf %90, %93 : vector<16x128xf32>
    %95 = vector.extract_strided_slice %70 {offsets = [3, 0], sizes = [1, 128], strides = [1, 1]} : vector<8x128xf32> to vector<1x128xf32>
    %96 = arith.mulf %83, %84 : vector<16x128xf32>
    %97 = vector.broadcast %95 : vector<1x128xf32> to vector<16x128xf32>
    %98 = arith.mulf %97, %96 : vector<16x128xf32>
    %99 = arith.addf %94, %98 : vector<16x128xf32>
    %c0_25 = arith.constant 0 : index
    %c0_26 = arith.constant 0 : index
    %100 = vector.load %arg4[%c0_25, %c0_26] : memref<16x128xf32, #tpu.memory_space<vmem>>, vector<16x128xf32>
    tpu.vector_store %arg4[%c0_25, %c0_26], %99 {strides = array<i32>} : memref<16x128xf32, #tpu.memory_space<vmem>>, vector<16x128xf32>,
    return
  }
  func.func @transform_0(%arg0: i32) -> (i32, i32) {
    %c0_i32 = arith.constant 0 : i32
    %c0_i32_0 = arith.constant 0 : i32
    return %arg0, %c0_i32 : i32, i32
  }
  func.func @transform_1(%arg0: i32) -> (i32, i32, i32) {
    %c0_i32 = arith.constant 0 : i32
    %c0_i32_0 = arith.constant 0 : i32
    %c0_i32_1 = arith.constant 0 : i32
    %c0_i32_2 = arith.constant 0 : i32
    return %c0_i32, %c0_i32_0, %c0_i32_1 : i32, i32, i32
  }
  func.func @transform_2(%arg0: i32) -> (i32, i32, i32) {
    %c0_i32 = arith.constant 0 : i32
    %c0_i32_0 = arith.constant 0 : i32
    %c0_i32_1 = arith.constant 0 : i32
    %c0_i32_2 = arith.constant 0 : i32
    return %c0_i32, %c0_i32_0, %c0_i32_1 : i32, i32, i32
  }
  func.func @transform_3(%arg0: i32) -> (i32, i32) {
    %c0_i32 = arith.constant 0 : i32
    %c0_i32_0 = arith.constant 0 : i32
    return %arg0, %c0_i32 : i32, i32
  }
}

</mosaic_0001>

<bundles_post_ra>
// kernel: tpu_custom_call.1
= control target key start
LH: loop header
LB: loop body
LE: loop exit
PB: predicated region body
PF: predicated region fallthrough
CT: control target
= control target key end

     0   :  { %8 = vsyncpa [#allocation3], 0  ;;  %s2021_s0 = inlined_call_operand.hbm [shape: f32[32,128], index: 0, kind: input, shape index: {}]   ;;  %s2022_s1 = inlined_call_operand.hbm [shape: bf16[3,128,256], index: 1, kind: input, shape index: {}]   ;;  %s2023_s2 = inlined_call_operand.hbm [shape: f32[3,8,128], index: 2, kind: input, shape index: {}]   ;;  %s2024_s3 = inlined_call_operand.hbm [shape: f32[32,128], index: 3, kind: output, shape index: {}]  }
   0x1   :  { %10 = vsyncpa [#allocation3 + $0x1], 0 }
   0x2   :  { %11 = vsyncpa [#allocation6], 0 }
   0x3   :  { %12 = vsyncpa [#allocation4], 0 }
   0x4   :  { %14 = vsyncpa [#allocation4 + $0x1], 0  ;;  %s1571_s12 = smov 0   ;;  %s1573_s13 = smov 0  }
   0x5   :  { %s1575_s14 = smov 0   ;;  %s1577_s15 = smov 0  }
   0x6 LB: > { %s1592_s16 = sadd.s32 4294967295, %s1540_s15   ;;  %s1148_s17 = sadd.s32 4294967294, %s1540_s15   ;;  %s1540_s15 = sphi %s1577_s15, %s2044_s15   ;;  %s1536_s14 = sphi %s1575_s14, %s2043_s14   ;;  %s1532_s13 = sphi %s1573_s13, %s2042_s13   ;;  %s1528_s12 = sphi %s1571_s12, %s2041_s12  }
   0x7   : > { %p40_p0 = scmp.ne.s32.totalorder %s1532_s13, %s1528_s12  ;;  %p2025_p1 = scmp.eq.s32.totalorder %s1592_s16, 0 }
   0x8   : > { %p112_p3 = scmp.eq.s32.totalorder %s1148_s17, 1  ;;  %p1149_p5 = scmp.ge.s32.totalorder %s1540_s15, 1 }
   0x9   : > { %p1601_p4 = por %p2025_p1, %p40_p0  ;;  %p119_p7 = scmp.lt.s32.totalorder %s1540_s15, 3 }
   0xa   : > { %p1606_p6 = por %p112_p3, %p40_p0  ;;  %s1542_s21 = smov [#allocation5]  }
   0xb   : > { %s2028_s18 = scalar_select %p1601_p4, 1, 0 }
   0xc   : > { %s2029_s19 = scalar_select %p1606_p6, 1, 0 }
   0xd   : > { %p1611_p8 = pnand %p1149_p5, %p119_p7  ;;  %s131_s22 = sshll.u32 %s1542_s21, 4  ;;  %s1615_s22 = int_to_ptr.vmem [resolvable:$true] %s131_s22 }
   0xe   : > { %s1543_s24 = smov [#allocation7]   ;;  %s1384_s28 = scalar_lea.hbm %s2022_s1, 6144 }
   0xf   : > { %p1252_p9 = pneg %p1611_p8  ;;  %s144_s25 = sshll.u32 %s1543_s24, 4  ;;  %s1626_s25 = int_to_ptr.vmem [resolvable:$true] %s144_s25 }
  0x10   : > { %p1385_p12 = scmp.ne.s32.totalorder %s2022_s1, %s1384_s28  ;;  %p1391_p5 = scmp.lt.u32.totalorder %s1384_s28, %s2022_s1 }
  0x11   : > { %p1622_p11 = pnand %p1252_p9, %p2025_p1 }
  0x13   : > { %p1386_p13 = pneg %p1622_p11 }
  0x15   : > { %p1387_p0 = pnand %p1386_p13, %p1385_p12 }
  0x17   : > { %p1388_p3 = pneg %p1387_p0 }
  0x19   : > { %p1393_p7 = pnand %p1391_p5, %p1388_p3 }
  0x1b   : > { %1396 = shalt.err (!%p1393_p7)
}
  0x1c   : > { %s1397_s6 = scalar_lea.vmem %s1615_s22, 6144  ;;  %p1405_p2 = scmp.lt.s32.totalorder %s1615_s22, %s1615_s22 }
  0x1d   : > { %p1398_p9 = scmp.ne.s32.totalorder %s1615_s22, %s1397_s6  ;;  %p1406_p12 = scmp.lt.s32.totalorder %s1397_s6, %s1397_s6 }
  0x1f   : > { %p1400_p10 = pnand %p1398_p9, %p1386_p13  ;;  %p1407_p0 = por %p1406_p12, %p1405_p2 }
  0x21   : > { %p1401_p1 = pneg %p1400_p10 }
  0x23   : > { %p1408_p6 = pnand %p1407_p0, %p1401_p1 }
  0x25   : > { %1411 = shalt.err (!%p1408_p6)
}
  0x26   : > { %s1544_s7 = smov 128   ;;  %s1545_s8 = smov 8  }
  0x27   : > { %1255 = dma.hbm_to_vmem [thread:$0]  (!%p1622_p11), %s2022_s1, 6144, %s1615_s22, [#allocation6], %s1544_s7, %s1544_s7, %s1545_s8  }
  0x28   : > { %s1412_s21 = scalar_lea.hbm %s2023_s2, 384 }
  0x29   : > { %p1413_p1 = scmp.ne.s32.totalorder %s2023_s2, %s1412_s21  ;;  %p1419_p10 = scmp.lt.u32.totalorder %s1412_s21, %s2023_s2 }
  0x2b   : > { %p1415_p2 = pnand %p1413_p1, %p1386_p13 }
  0x2d   : > { %p1416_p6 = pneg %p1415_p2 }
  0x2f   : > { %p1421_p3 = pnand %p1419_p10, %p1416_p6 }
  0x31   : > { %1424 = shalt.err (!%p1421_p3)
}
  0x32   : > { %s1425_s22 = scalar_lea.vmem %s1626_s25, 384  ;;  %p1433_p12 = scmp.lt.s32.totalorder %s1626_s25, %s1626_s25 }
  0x33   : > { %p1426_p5 = scmp.ne.s32.totalorder %s1626_s25, %s1425_s22  ;;  %p1434_p0 = scmp.lt.s32.totalorder %s1425_s22, %s1425_s22 }
  0x35   : > { %p1428_p7 = pnand %p1426_p5, %p1386_p13  ;;  %p1435_p1 = por %p1434_p0, %p1433_p12 }
  0x37   : > { %p1429_p9 = pneg %p1428_p7 }
  0x39   : > { %p1436_p2 = pnand %p1435_p1, %p1429_p9 }
  0x3b   : > { %1439 = shalt.err (!%p1436_p2)
}
  0x3c   : > { %1258 = dma.hbm_to_vmem [thread:$0]  (!%p1622_p11), %s2023_s2, 384, %s1626_s25, [#allocation6], %s1544_s7, %s1544_s7, %s1545_s8  }
  0x3d   : > { %s1687_s23 = sadd.s32 1, %s1540_s15   ;;  %s27_s4 = sadd.s32 1, %s1536_s14 }
  0x3e   : > { %s24_s5 = ssub.s32 %s1540_s15, %s1687_s23  ;;  %p34_p13 = scmp.ne.s32.totalorder %s1536_s14, %s1532_s13 }
  0x3f   : > { %p25_p6 = scmp.eq.s32.totalorder %s24_s5, 0  ;;  %p35_p10 = scmp.eq.s32.totalorder %s1540_s15, 0 }
  0x40   : > { %p2032_p3 = scmp.eq.s32.totalorder %s1592_s16, 1  ;;  %p1269_p7 = scmp.lt.s32.totalorder %s1540_s15, 2 }
  0x41   : > { %s1703_s9 = scalar_select %p25_p6, %s1536_s14, %s27_s4  }
  0x42   : > { %p1697_p5 = por %p2032_p3, %p34_p13  ;;  %p36_p9 = por %p35_p10, %p34_p13 }
  0x43   : > { %s158_s10 = sand.u32 1, %s1536_s14   ;;  %s1214_s25 = sshll.u32 %s1540_s15, 8 }
  0x44   : > { %s2033_s6 = scalar_select %p1697_p5, 1, 0 }
  0x45   : > { %s1153_s11 = sshll.u32 %s158_s10, 4  ;;  %s1710_s24 = scalar_lea.hbm %s2021_s0, %s1214_s25 }
  0x46   : > { %s162_s26 = scalar_lea.vmem [#allocation2], %s1153_s11  ;;  %p1714_p11 = pnand %p1269_p7, %p36_p9 }
  0x47   : > { %s169_s27 = sshll.u32 %s162_s26, 4  ;;  %s1718_s22 = scalar_lea.sflag [#allocation3], %s158_s10  ;;  %s1712_s27 = int_to_ptr.vmem [resolvable:$true] %s169_s27 }
  0x48   : > { %s1440_s29 = scalar_lea.hbm %s1710_s24, 256  ;;  %p1442_p0 = pneg %p1714_p11 }
  0x49   : > { %p1441_p12 = scmp.ne.s32.totalorder %s1710_s24, %s1440_s29  ;;  %s1445_s5 = scalar_lea.hbm %s2021_s0, 512 }
  0x4a   : > { %p1446_p13 = scmp.lt.u32.totalorder %s1710_s24, %s2021_s0  ;;  %p1447_p6 = scmp.lt.u32.totalorder %s1445_s5, %s1440_s29 }
  0x4b   : > { %p1443_p1 = pnand %p1442_p0, %p1441_p12  ;;  %p1449_p3 = scmp.lt.u32.totalorder %s1440_s29, %s1710_s24 }
  0x4c   : > { %p1448_p10 = por %p1447_p6, %p1446_p13 }
  0x4d   : > { %p1444_p2 = pneg %p1443_p1 }
  0x4e   : > { %p1450_p7 = por %p1449_p3, %p1448_p10 }
  0x50   : > { %p1451_p9 = pnand %p1450_p7, %p1444_p2 }
  0x52   : > { %1454 = shalt.err (!%p1451_p9)
}
  0x53   : > { %s1455_s10 = scalar_lea.vmem %s1712_s27, 256  ;;  %s1546_s17 = smov [#allocation2]  }
  0x54   : > { %p1456_p12 = scmp.ne.s32.totalorder %s1712_s27, %s1455_s10  ;;  %s1460_s21 = sshll.u32 %s1546_s17, 4  ;;  %s1461_s21 = int_to_ptr.vmem [resolvable:$false] %s1460_s21 }
  0x55   : > { %s1462_s26 = scalar_lea.vmem %s1461_s21, 512  ;;  %p1463_p4 = scmp.lt.s32.totalorder %s1712_s27, %s1461_s21 }
  0x56   : > { %p1458_p1 = pnand %p1456_p12, %p1442_p0  ;;  %p1464_p13 = scmp.lt.s32.totalorder %s1462_s26, %s1455_s10 }
  0x58   : > { %p1459_p5 = pneg %p1458_p1  ;;  %p1465_p6 = por %p1464_p13, %p1463_p4 }
  0x5a   : > { %p1466_p10 = pnand %p1465_p6, %p1459_p5 }
  0x5c   : > { %1469 = shalt.err (!%p1466_p10)
}
  0x5d   : > { %1262 = dma.hbm_to_vmem [thread:$0]  (!%p1714_p11), %s1710_s24, 256, %s1712_s27, %s1718_s22, %s1544_s7, %s1544_s7, %s1545_s8  }
  0x5e   : > { %181 = sbr.rel (%p1611_p8) target bundleno = 998 (0x3e6), region = 32  ;;  %s1752_s29 = sand.u32 (!%p1611_p8), 1, %s1532_s13  }
  0x5f   : > { %s1157_s30 = sshll.u32 (!%p1611_p8), %s1752_s29, 4  ;;  %s184_s4 = scalar_lea.sflag (!%p1611_p8), [#allocation3], %s1752_s29 }
  0x60   : > { %s1758_s28 = scalar_lea.vmem (!%p1611_p8), [#allocation2], %s1157_s30  ;;  %p2035_p4 = scmp.ne.s32.totalorder (!%p1611_p8), %s2028_s18, 0 }
  0x65   : > { %1515 = dma.done.wait (%p2035_p4), %s184_s4, 256  }
  0x66   : > { %1517 = vsyncadd (%p2035_p4), %s184_s4, 4294967040  ;;  %p2036_p5 = scmp.eq.s32.totalorder %s1592_s16, 0 }
  0x68   : > { %1519 = dma.done.wait (%p2036_p5), [#allocation6], 6528   ;;  %p2037_p8 = pmov %p2036_p5 }
  0x69   : > { %v1547_v0 = vmov 0   ;;  %v1312_v1 = vld [vmem:[#allocation5 + $0x4] ss:$8 sps:$4 sm:$0xff]   ;;  %v1314_v2 = vld [vmem:[#allocation5] ss:$8 sps:$4 sm:$0xff]   ;;  %v464_v58 = vlaneseq  ;;  %s217_s18 = scalar_lea.vmem [#allocation8], %s1157_s30 }
  0x6a   : > { %1521 = vsyncadd (%p2037_p8), [#allocation6], 4294960768  ;;  %406 = vmatprep.mubr.bf16.mxu0 %v1547_v0  ;;  %363 = vmatprep.mubr.bf16.mxu1 %v1547_v0  ;;  %v1315_v3 = vld [vmem:[#allocation5 + $0x14] ss:$8 sps:$4 sm:$0xff]   ;;  %v1770_v4 = vld [vmem:[#allocation5 + $0x10] ss:$8 sps:$4 sm:$0xff]  }
  0x6b   : > { %374 = vmatprep.subr.bf16.mxu0 %v1312_v1  ;;  %331 = vmatprep.subr.bf16.mxu1 %v1312_v1  ;;  %v1318_v5 = vld [vmem:[#allocation5 + $0x24] ss:$8 sps:$4 sm:$0xff]   ;;  %v1773_v6 = vld [vmem:[#allocation5 + $0x20] ss:$8 sps:$4 sm:$0xff]   ;;  %v1321_v7 = vld [vmem:[#allocation5 + $0x34] ss:$8 sps:$4 sm:$0xff]  }
  0x6c   : > { %375 = vmatpush1.bf16.msra.mxu0 %v1314_v2  ;;  %332 = vmatpush1.bf16.msra.mxu1 %v1314_v2  ;;  %v1323_v8 = vld [vmem:[#allocation5 + $0x30] ss:$8 sps:$4 sm:$0xff]   ;;  %v1324_v9 = vld [vmem:[#allocation5 + $0x44] ss:$8 sps:$4 sm:$0xff]   ;;  %v1326_v10 = vld [vmem:[#allocation5 + $0x40] ss:$8 sps:$4 sm:$0xff]  }
  0x6d   : > { %376 = vmatprep.subr.bf16.mxu0 %v1315_v3  ;;  %333 = vmatprep.subr.bf16.mxu1 %v1315_v3  ;;  %v1327_v11 = vld [vmem:[#allocation5 + $0x54] ss:$8 sps:$4 sm:$0xff]   ;;  %v1329_v12 = vld [vmem:[#allocation5 + $0x50] ss:$8 sps:$4 sm:$0xff]   ;;  %v1330_v15 = vld [vmem:[#allocation5 + $0x64] ss:$8 sps:$4 sm:$0xff]  }
  0x6e   : > { %v221_v13 = vld [vmem:[%s1758_s28] sm:$0xff]  ;;  %v222_v14 = vld [vmem:[%s1758_s28 + $0x8] sm:$0xff]  ;;  %v465_v59 = vshrl.u32 %v464_v58, 7  ;;  %s1056_s20 = sshll.u32 %s217_s18, 4  ;;  %s1215_s7 = sshll.u32 %s1592_s16, 8  ;;  %s1972_s20 = int_to_ptr.vmem [resolvable:$true] %s1056_s20 }
  0x6f   : > { %v1332_v16 = vld [vmem:[#allocation5 + $0x60] ss:$8 sps:$4 sm:$0xff]   ;;  %v240_v17 = vpack.c.bf16 %v222_v14, %v221_v13  ;;  %v1333_v18 = vld [vmem:[#allocation5 + $0x74] ss:$8 sps:$4 sm:$0xff]   ;;  %v1335_v21 = vld [vmem:[#allocation5 + $0x70] ss:$8 sps:$4 sm:$0xff]   ;;  %s1977_s27 = scalar_lea.hbm %s2024_s3, %s1215_s7 }
  0x70   : > { %377 = vmatpush1.bf16.msra.mxu0 %v1770_v4  ;;  %334 = vmatpush1.bf16.msra.mxu1 %v1770_v4  ;;  %v1780_v24 = vld [vmem:[#allocation5 + $0x84] ss:$8 sps:$4 sm:$0xff]   ;;  %v1782_v26 = vld [vmem:[#allocation5 + $0x80] ss:$8 sps:$4 sm:$0xff]   ;;  %v1785_v27 = vld [vmem:[#allocation5 + $0x94] ss:$8 sps:$4 sm:$0xff]  }
  0x71   : > { %378 = vmatprep.subr.bf16.mxu0 %v1318_v5  ;;  %335 = vmatprep.subr.bf16.mxu1 %v1318_v5  ;;  %v241_v19 = vunpack.c.l.bf16 %v240_v17  ;;  %v242_v20 = vunpack.c.h.bf16 %v240_v17  ;;  %v1789_v28 = vld [vmem:[#allocation5 + $0x90] ss:$8 sps:$4 sm:$0xff]   ;;  %v1792_v29 = vld [vmem:[#allocation5 + $0xa4] ss:$8 sps:$4 sm:$0xff]   ;;  %v1797_v30 = vld [vmem:[#allocation5 + $0xa0] ss:$8 sps:$4 sm:$0xff]  }
  0x72   : > { %v1803_v36 = vld [vmem:[#allocation5 + $0xb4] ss:$8 sps:$4 sm:$0xff]   ;;  %v1805_v37 = vld [vmem:[#allocation5 + $0xb0] ss:$8 sps:$4 sm:$0xff]   ;;  %v1809_v38 = vld [vmem:[#allocation5 + $0xc4] ss:$8 sps:$4 sm:$0xff]  }
  0x73   : > { %v243_v22 = vsub.f32 %v221_v13, %v241_v19  ;;  %v244_v23 = vsub.f32 %v222_v14, %v242_v20  ;;  %v1811_v39 = vld [vmem:[#allocation5 + $0xc0] ss:$8 sps:$4 sm:$0xff]   ;;  %v1815_v40 = vld [vmem:[#allocation5 + $0xd4] ss:$8 sps:$4 sm:$0xff]   ;;  %v1817_v41 = vld [vmem:[#allocation5 + $0xd0] ss:$8 sps:$4 sm:$0xff]  }
  0x74   : > { %379 = vmatpush1.bf16.msra.mxu0 %v1773_v6  ;;  %336 = vmatpush1.bf16.msra.mxu1 %v1773_v6  ;;  %v1821_v42 = vld [vmem:[#allocation5 + $0xe4] ss:$8 sps:$4 sm:$0xff]   ;;  %v1823_v43 = vld [vmem:[#allocation5 + $0xe0] ss:$8 sps:$4 sm:$0xff]   ;;  %v1827_v44 = vld [vmem:[#allocation5 + $0xf4] ss:$8 sps:$4 sm:$0xff]  }
  0x75   : > { %380 = vmatprep.subr.bf16.mxu0 %v1321_v7  ;;  %337 = vmatprep.subr.bf16.mxu1 %v1321_v7  ;;  %v245_v25 = vpack.c.bf16 %v244_v23, %v243_v22  ;;  %v1829_v45 = vld [vmem:[#allocation5 + $0xf0] ss:$8 sps:$4 sm:$0xff]   ;;  %v1834_v46 = vld [vmem:[#allocation5 + $0x100] ss:$8 sps:$4 sm:$0xff]   ;;  %v1836_v47 = vld [vmem:[#allocation5 + $0x104] ss:$8 sps:$4 sm:$0xff]  }
  0x76   : > { %v1838_v48 = vld [vmem:[#allocation5 + $0x114] ss:$8 sps:$4 sm:$0xff]   ;;  %v1842_v49 = vld [vmem:[#allocation5 + $0x110] ss:$8 sps:$4 sm:$0xff]   ;;  %v1845_v50 = vld [vmem:[#allocation5 + $0x124] ss:$8 sps:$4 sm:$0xff]  }
  0x77   : > { %v246_v31 = vunpack.c.l.bf16 %v245_v25  ;;  %v247_v32 = vunpack.c.h.bf16 %v245_v25  ;;  %v1848_v51 = vld [vmem:[#allocation5 + $0x120] ss:$8 sps:$4 sm:$0xff]   ;;  %v1851_v52 = vld [vmem:[#allocation5 + $0x134] ss:$8 sps:$4 sm:$0xff]   ;;  %v1854_v54 = vld [vmem:[#allocation5 + $0x130] ss:$8 sps:$4 sm:$0xff]  }
  0x78   : > { %381 = vmatpush1.bf16.msra.mxu0 %v1323_v8  ;;  %338 = vmatpush1.bf16.msra.mxu1 %v1323_v8  ;;  %v1858_v60 = vsub.s32 1, %v465_v59  ;;  %v239_v61 = vld [vmem:[#allocation7] sm:$0xff]  ;;  %v1860_v62 = vsub.s32 2, %v465_v59  ;;  %v1862_v63 = vsub.s32 0, %v465_v59  ;;  %s1043_s22 = scalar_lea.sflag [#allocation4], %s1752_s29  ;;  %s1470_s5 = scalar_lea.vmem %s1972_s20, 256 }
  0x79   : > { %382 = vmatprep.subr.bf16.mxu0 %v1324_v9  ;;  %339 = vmatprep.subr.bf16.mxu1 %v1324_v9  ;;  %v248_v33 = vsub.f32 %v243_v22, %v246_v31  ;;  %v249_v34 = vsub.f32 %v244_v23, %v247_v32  ;;  %p1471_p11 = scmp.ne.s32.totalorder %s1972_s20, %s1470_s5  ;;  %p2038_p0 = scmp.ne.s32.totalorder %s2033_s6, 0 }
  0x7a   : > { %s1548_s16 = smov [#allocation8]  }
  0x7b   : > { %v250_v35 = vpack.c.bf16 %v249_v34, %v248_v33  ;;  %p1472_p2 = pnand %p1471_p11, %p2038_p0  ;;  %s1474_s11 = sshll.u32 %s1548_s16, 4  ;;  %s1475_s11 = int_to_ptr.vmem [resolvable:$false] %s1474_s11 }
  0x7c   : > { %383 = vmatpush1.bf16.msra.mxu0 %v1326_v10  ;;  %340 = vmatpush1.bf16.msra.mxu1 %v1326_v10  ;;  %s1476_s25 = scalar_lea.vmem %s1475_s11, 512  ;;  %p1477_p7 = scmp.lt.s32.totalorder %s1972_s20, %s1475_s11 }
  0x7d   : > { %384 = vmatprep.subr.bf16.mxu0 %v1327_v11  ;;  %341 = vmatprep.subr.bf16.mxu1 %v1327_v11  ;;  %p1473_p3 = pneg %p1472_p2  ;;  %p1478_p9 = scmp.lt.s32.totalorder %s1476_s25, %s1470_s5 }
  0x7f   : > { %p1479_p12 = por %p1478_p9, %p1477_p7 }
  0x80   : > { %385 = vmatpush1.bf16.msra.mxu0 %v1329_v12  ;;  %342 = vmatpush1.bf16.msra.mxu1 %v1329_v12 }
  0x81   : > { %386 = vmatprep.subr.bf16.mxu0 %v1330_v15  ;;  %343 = vmatprep.subr.bf16.mxu1 %v1330_v15  ;;  %p1480_p1 = pnand %p1479_p12, %p1473_p3 }
  0x84   : > { %387 = vmatpush1.bf16.msra.mxu0 %v1332_v16  ;;  %344 = vmatpush1.bf16.msra.mxu1 %v1332_v16 }
  0x85   : > { %388 = vmatprep.subr.bf16.mxu0 %v1333_v18  ;;  %345 = vmatprep.subr.bf16.mxu1 %v1333_v18 }
  0x88   : > { %389 = vmatpush1.bf16.msra.mxu0 %v1335_v21  ;;  %346 = vmatpush1.bf16.msra.mxu1 %v1335_v21 }
  0x89   : > { %417 = vmatprep.subr.bf16.mxu0 %v1312_v1  ;;  %604 = vmatprep.subr.bf16.mxu1 %v1780_v24  ;;  %v1864_v1 = vsub.s32 3, %v465_v59 }
  0x8b   : > { %407 = vmatmul.mubr.bf16.vlgmr.msra.gmra.mrb[0].mxu0 %v240_v17  ;;  %364 = vmatmul.mubr.bf16.vlgmr.msra.gmra.mrb[0].mxu1 %v245_v25 }
  0x8c   : > { %418 = vmatpush1.bf16.msra.mxu0 %v1314_v2  ;;  %449 = vmatprep.mubr.bf16.mxu0 %v1547_v0  ;;  %v467_v2 = vrot.slane %v239_v61, %v1858_v60 }
  0x8d   : > { %419 = vmatprep.subr.bf16.mxu0 %v1315_v3  ;;  %605 = vmatpush1.bf16.msra.mxu1 %v1782_v26 }
  0x8e   : > { %606 = vmatprep.subr.bf16.mxu1 %v1785_v27  ;;  %636 = vmatprep.mubr.bf16.mxu1 %v1547_v0 }
  0x90   : > { %420 = vmatpush1.bf16.msra.mxu0 %v1770_v4  ;;  %v479_v4 = vrot.slane %v239_v61, %v1860_v62 }
  0x91   : > { %421 = vmatprep.subr.bf16.mxu0 %v1318_v5  ;;  %607 = vmatpush1.bf16.msra.mxu1 %v1789_v28 }
  0x92   : > { %608 = vmatprep.subr.bf16.mxu1 %v1792_v29 }
  0x94   : > { %422 = vmatpush1.bf16.msra.mxu0 %v1773_v6  ;;  %v473_v6 = vrot.slane %v239_v61, %v1862_v63 }
  0x95   : > { %423 = vmatprep.subr.bf16.mxu0 %v1321_v7  ;;  %609 = vmatpush1.bf16.msra.mxu1 %v1797_v30 }
  0x96   : > { %610 = vmatprep.subr.bf16.mxu1 %v1803_v36 }
  0x98   : > { %424 = vmatpush1.bf16.msra.mxu0 %v1323_v8 }
  0x99   : > { %425 = vmatprep.subr.bf16.mxu0 %v1324_v9  ;;  %611 = vmatpush1.bf16.msra.mxu1 %v1805_v37  ;;  %v489_v9 = vrot.slane %v239_v61, %v1864_v1 }
  0x9a   : > { %612 = vmatprep.subr.bf16.mxu1 %v1809_v38 }
  0x9c   : > { %426 = vmatpush1.bf16.msra.mxu0 %v1326_v10 }
  0x9d   : > { %427 = vmatprep.subr.bf16.mxu0 %v1327_v11  ;;  %613 = vmatpush1.bf16.msra.mxu1 %v1811_v39 }
  0x9e   : > { %614 = vmatprep.subr.bf16.mxu1 %v1815_v40 }
  0xa0   : > { %428 = vmatpush1.bf16.msra.mxu0 %v1329_v12 }
  0xa1   : > { %429 = vmatprep.subr.bf16.mxu0 %v1330_v15  ;;  %615 = vmatpush1.bf16.msra.mxu1 %v1817_v41 }
  0xa2   : > { %616 = vmatprep.subr.bf16.mxu1 %v1821_v42 }
  0xa4   : > { %430 = vmatpush1.bf16.msra.mxu0 %v1332_v16 }
  0xa5   : > { %431 = vmatprep.subr.bf16.mxu0 %v1333_v18  ;;  %617 = vmatpush1.bf16.msra.mxu1 %v1823_v43 }
  0xa6   : > { %618 = vmatprep.subr.bf16.mxu1 %v1827_v44 }
  0xa8   : > { %432 = vmatpush1.bf16.msra.mxu0 %v1335_v21 }
  0xa9   : > { %619 = vmatpush1.bf16.msra.mxu1 %v1829_v45  ;;  %877 = vmatprep.subr.bf16.mxu0 %v1836_v47 }
  0xaa   : > { %647 = vmatprep.subr.bf16.mxu1 %v1780_v24 }
  0xab   : > { %450 = vmatmul.mubr.bf16.vlgmr.msra.gmra.mrb[0].mxu0 %v250_v35 }
  0xac   : > { %909 = vmatprep.mubr.bf16.mxu0 %v1547_v0  ;;  %878 = vmatpush1.bf16.msra.mxu0 %v1834_v46 }
  0xad   : > { %879 = vmatprep.subr.bf16.mxu0 %v1838_v48 }
  0xb0   : > { %880 = vmatpush1.bf16.msra.mxu0 %v1842_v49 }
  0xb1   : > { %881 = vmatprep.subr.bf16.mxu0 %v1845_v50 }
  0xb4   : > { %882 = vmatpush1.bf16.msra.mxu0 %v1848_v51 }
  0xb5   : > { %883 = vmatprep.subr.bf16.mxu0 %v1851_v52 }
  0xb8   : > { %884 = vmatpush1.bf16.msra.mxu0 %v1854_v54 }
 0x15e   : > { %v365_v53 = vpop.f32.mrb[0].mxu1 }
 0x15f   : > { %v367_v55 = vpop.f32.mrb[1].mxu1 }
 0x160   : > { %v369_v56 = vpop.f32.mrb[2].mxu1 }
 0x161   : > { %v371_v57 = vpop.f32.mrb[3].mxu1 }
 0x17e   : > { %v451_v3 = vpop.f32.mrb[0].mxu0 }
 0x17f   : > { %v1216_v5 = vadd.f32 %v451_v3, %v365_v53  ;;  %v453_v7 = vpop.f32.mrb[1].mxu0 }
 0x180   : > { %v1217_v8 = vadd.f32 %v453_v7, %v367_v55  ;;  %v455_v10 = vpop.f32.mrb[2].mxu0 }
 0x181   : > { %v468_v11 = vmul.f32 %v1216_v5, %v467_v2  ;;  %v1218_v12 = vadd.f32 %v455_v10, %v369_v56  ;;  %v457_v13 = vpop.f32.mrb[3].mxu0 }
 0x182   : > { %v480_v14 = vmul.f32 %v1217_v8, %v479_v4  ;;  %v484_v15 = vmul.f32 %v1217_v8, %v1216_v5  ;;  %v1219_v16 = vadd.f32 %v457_v13, %v371_v57 }
 0x183   : > { %v474_v17 = vadd.f32 %v473_v6, %v468_v11  ;;  %v469_v18 = vmul.f32 %v1218_v12, %v467_v2 }
 0x184   : > { %v490_v19 = vmul.f32 %v489_v9, %v484_v15  ;;  %v481_v20 = vmul.f32 %v1219_v16, %v479_v4  ;;  %v485_v21 = vmul.f32 %v1219_v16, %v1218_v12 }
 0x185   : > { %v482_v22 = vadd.f32 %v480_v14, %v474_v17  ;;  %v475_v23 = vadd.f32 %v473_v6, %v469_v18 }
 0x186   : > { %v491_v25 = vmul.f32 %v489_v9, %v485_v21 }
 0x187   : > { %v492_v31 = vadd.f32 %v490_v19, %v482_v22  ;;  %v483_v32 = vadd.f32 %v481_v20, %v475_v23 }
 0x189   : > { %v493_v33 = vadd.f32 %v491_v25, %v483_v32 }
 0x18b   : > { %v513_v34 = vpack.c.bf16 %v493_v33, %v492_v31 }
 0x18d   : > { %v515_v35 = vunpack.c.h.bf16 %v513_v34  ;;  %v514_v53 = vunpack.c.l.bf16 %v513_v34 }
 0x18f   : > { %v517_v55 = vsub.f32 %v493_v33, %v515_v35  ;;  %v516_v56 = vsub.f32 %v492_v31, %v514_v53 }
 0x191   : > { %v518_v58 = vpack.c.bf16 %v517_v55, %v516_v56 }
 0x193   : > { %637 = vmatmul.mubr.bf16.vlgmr.msra.gmra.mrb[4].mxu1 %v518_v58  ;;  %v519_v59 = vunpack.c.l.bf16 %v518_v58  ;;  %v520_v57 = vunpack.c.h.bf16 %v518_v58 }
 0x194   : > { %648 = vmatpush1.bf16.msra.mxu1 %v1782_v26  ;;  %679 = vmatprep.mubr.bf16.mxu1 %v1547_v0 }
 0x195   : > { %649 = vmatprep.subr.bf16.mxu1 %v1785_v27  ;;  %v521_v61 = vsub.f32 %v516_v56, %v519_v59  ;;  %v522_v2 = vsub.f32 %v517_v55, %v520_v57 }
 0x197   : > { %v523_v3 = vpack.c.bf16 %v522_v2, %v521_v61 }
 0x198   : > { %650 = vmatpush1.bf16.msra.mxu1 %v1789_v28 }
 0x199   : > { %651 = vmatprep.subr.bf16.mxu1 %v1792_v29 }
 0x19c   : > { %652 = vmatpush1.bf16.msra.mxu1 %v1797_v30 }
 0x19d   : > { %653 = vmatprep.subr.bf16.mxu1 %v1803_v36 }
 0x1a0   : > { %654 = vmatpush1.bf16.msra.mxu1 %v1805_v37 }
 0x1a1   : > { %655 = vmatprep.subr.bf16.mxu1 %v1809_v38 }
 0x1a4   : > { %656 = vmatpush1.bf16.msra.mxu1 %v1811_v39 }
 0x1a5   : > { %657 = vmatprep.subr.bf16.mxu1 %v1815_v40 }
 0x1a8   : > { %658 = vmatpush1.bf16.msra.mxu1 %v1817_v41 }
 0x1a9   : > { %659 = vmatprep.subr.bf16.mxu1 %v1821_v42 }
 0x1ac   : > { %660 = vmatpush1.bf16.msra.mxu1 %v1823_v43 }
 0x1ad   : > { %661 = vmatprep.subr.bf16.mxu1 %v1827_v44 }
 0x1b0   : > { %662 = vmatpush1.bf16.msra.mxu1 %v1829_v45 }
 0x1b1   : > { %690 = vmatprep.subr.bf16.mxu1 %v1780_v24  ;;  %v1903_v24 = vld [vmem:[#allocation5 + $0x144] ss:$8 sps:$4 sm:$0xff]  }
 0x1b2   : > { %885 = vmatprep.subr.bf16.mxu0 %v1903_v24 }
 0x1b3   : > { %680 = vmatmul.mubr.bf16.vlgmr.msra.gmra.mrb[4].mxu1 %v513_v34 }
 0x1b4   : > { %691 = vmatpush1.bf16.msra.mxu1 %v1782_v26  ;;  %722 = vmatprep.mubr.bf16.mxu1 %v1547_v0  ;;  %v1905_v26 = vld [vmem:[#allocation5 + $0x140] ss:$8 sps:$4 sm:$0xff]  }
 0x1b5   : > { %692 = vmatprep.subr.bf16.mxu1 %v1785_v27  ;;  %886 = vmatpush1.bf16.msra.mxu0 %v1905_v26  ;;  %v1909_v27 = vld [vmem:[#allocation5 + $0x154] ss:$8 sps:$4 sm:$0xff]  }
 0x1b6   : > { %887 = vmatprep.subr.bf16.mxu0 %v1909_v27 }
 0x1b8   : > { %693 = vmatpush1.bf16.msra.mxu1 %v1789_v28  ;;  %v1911_v28 = vld [vmem:[#allocation5 + $0x150] ss:$8 sps:$4 sm:$0xff]  }
 0x1b9   : > { %694 = vmatprep.subr.bf16.mxu1 %v1792_v29  ;;  %888 = vmatpush1.bf16.msra.mxu0 %v1911_v28  ;;  %v1915_v29 = vld [vmem:[#allocation5 + $0x164] ss:$8 sps:$4 sm:$0xff]  }
 0x1ba   : > { %889 = vmatprep.subr.bf16.mxu0 %v1915_v29 }
 0x1bc   : > { %695 = vmatpush1.bf16.msra.mxu1 %v1797_v30  ;;  %v1917_v30 = vld [vmem:[#allocation5 + $0x160] ss:$8 sps:$4 sm:$0xff]  }
 0x1bd   : > { %696 = vmatprep.subr.bf16.mxu1 %v1803_v36  ;;  %890 = vmatpush1.bf16.msra.mxu0 %v1917_v30  ;;  %v1921_v36 = vld [vmem:[#allocation5 + $0x174] ss:$8 sps:$4 sm:$0xff]  }
 0x1be   : > { %891 = vmatprep.subr.bf16.mxu0 %v1921_v36 }
 0x1c0   : > { %697 = vmatpush1.bf16.msra.mxu1 %v1805_v37  ;;  %v1923_v37 = vld [vmem:[#allocation5 + $0x170] ss:$8 sps:$4 sm:$0xff]  }
 0x1c1   : > { %698 = vmatprep.subr.bf16.mxu1 %v1809_v38  ;;  %892 = vmatpush1.bf16.msra.mxu0 %v1923_v37  ;;  %v512_v38 = vld [vmem:[#allocation7 + $0x8] sm:$0xff] }
 0x1c2   : > { %920 = vmatprep.subr.bf16.mxu0 %v1836_v47 }
 0x1c4   : > { %699 = vmatpush1.bf16.msra.mxu1 %v1811_v39  ;;  %v740_v39 = vrot.slane %v512_v38, %v1858_v60 }
 0x1c5   : > { %700 = vmatprep.subr.bf16.mxu1 %v1815_v40  ;;  %v752_v40 = vrot.slane %v512_v38, %v1860_v62 }
 0x1c8   : > { %701 = vmatpush1.bf16.msra.mxu1 %v1817_v41  ;;  %v746_v41 = vrot.slane %v512_v38, %v1862_v63 }
 0x1c9   : > { %702 = vmatprep.subr.bf16.mxu1 %v1821_v42 }
 0x1cc   : > { %703 = vmatpush1.bf16.msra.mxu1 %v1823_v43  ;;  %v762_v43 = vrot.slane %v512_v38, %v1864_v1 }
 0x1cd   : > { %704 = vmatprep.subr.bf16.mxu1 %v1827_v44 }
 0x1d0   : > { %705 = vmatpush1.bf16.msra.mxu1 %v1829_v45 }
 0x1d3   : > { %723 = vmatmul.mubr.bf16.vlgmr.msra.gmra.mrb[4].mxu1 %v523_v3 }
 0x2a6   : > { %v724_v42 = vpop.f32.mrb[4].mxu1 }
 0x2a7   : > { %v741_v44 = vmul.f32 %v740_v39, %v724_v42  ;;  %v726_v45 = vpop.f32.mrb[5].mxu1 }
 0x2a8   : > { %v753_v4 = vmul.f32 %v752_v40, %v726_v45  ;;  %v757_v5 = vmul.f32 %v726_v45, %v724_v42  ;;  %v728_v6 = vpop.f32.mrb[6].mxu1 }
 0x2a9   : > { %v747_v7 = vadd.f32 %v746_v41, %v741_v44  ;;  %v742_v8 = vmul.f32 %v740_v39, %v728_v6  ;;  %v730_v9 = vpop.f32.mrb[7].mxu1 }
 0x2aa   : > { %v763_v10 = vmul.f32 %v762_v43, %v757_v5  ;;  %v754_v11 = vmul.f32 %v752_v40, %v730_v9  ;;  %v758_v12 = vmul.f32 %v730_v9, %v728_v6 }
 0x2ab   : > { %v755_v13 = vadd.f32 %v753_v4, %v747_v7  ;;  %v748_v14 = vadd.f32 %v746_v41, %v742_v8 }
 0x2ac   : > { %v764_v15 = vmul.f32 %v762_v43, %v758_v12 }
 0x2ad   : > { %v765_v16 = vadd.f32 %v763_v10, %v755_v13  ;;  %v756_v17 = vadd.f32 %v754_v11, %v748_v14 }
 0x2af   : > { %v766_v18 = vadd.f32 %v764_v15, %v756_v17 }
 0x2b1   : > { %v786_v19 = vpack.c.bf16 %v766_v18, %v765_v16 }
 0x2b3   : > { %v787_v20 = vunpack.c.l.bf16 %v786_v19  ;;  %v788_v21 = vunpack.c.h.bf16 %v786_v19 }
 0x2b5   : > { %v790_v22 = vsub.f32 %v766_v18, %v788_v21  ;;  %v789_v23 = vsub.f32 %v765_v16, %v787_v20 }
 0x2b7   : > { %v791_v25 = vpack.c.bf16 %v790_v22, %v789_v23 }
 0x2b9   : > { %910 = vmatmul.mubr.bf16.vlgmr.msra.gmra.mrb[4].mxu0 %v791_v25  ;;  %v792_v31 = vunpack.c.l.bf16 %v791_v25  ;;  %v793_v32 = vunpack.c.h.bf16 %v791_v25 }
 0x2ba   : > { %921 = vmatpush1.bf16.msra.mxu0 %v1834_v46  ;;  %952 = vmatprep.mubr.bf16.mxu0 %v1547_v0 }
 0x2bb   : > { %922 = vmatprep.subr.bf16.mxu0 %v1838_v48  ;;  %v794_v33 = vsub.f32 %v789_v23, %v792_v31  ;;  %v795_v34 = vsub.f32 %v790_v22, %v793_v32 }
 0x2bd   : > { %v796_v35 = vpack.c.bf16 %v795_v34, %v794_v33 }
 0x2be   : > { %923 = vmatpush1.bf16.msra.mxu0 %v1842_v49 }
 0x2bf   : > { %924 = vmatprep.subr.bf16.mxu0 %v1845_v50 }
 0x2c2   : > { %925 = vmatpush1.bf16.msra.mxu0 %v1848_v51 }
 0x2c3   : > { %926 = vmatprep.subr.bf16.mxu0 %v1851_v52 }
 0x2c6   : > { %927 = vmatpush1.bf16.msra.mxu0 %v1854_v54 }
 0x2c7   : > { %928 = vmatprep.subr.bf16.mxu0 %v1903_v24 }
 0x2ca   : > { %929 = vmatpush1.bf16.msra.mxu0 %v1905_v26 }
 0x2cb   : > { %930 = vmatprep.subr.bf16.mxu0 %v1909_v27 }
 0x2ce   : > { %931 = vmatpush1.bf16.msra.mxu0 %v1911_v28 }
 0x2cf   : > { %932 = vmatprep.subr.bf16.mxu0 %v1915_v29 }
 0x2d2   : > { %933 = vmatpush1.bf16.msra.mxu0 %v1917_v30 }
 0x2d3   : > { %934 = vmatprep.subr.bf16.mxu0 %v1921_v36 }
 0x2d6   : > { %935 = vmatpush1.bf16.msra.mxu0 %v1923_v37 }
 0x2d7   : > { %963 = vmatprep.subr.bf16.mxu0 %v1836_v47 }
 0x2d9   : > { %953 = vmatmul.mubr.bf16.vlgmr.msra.gmra.mrb[4].mxu0 %v786_v19 }
 0x2da   : > { %964 = vmatpush1.bf16.msra.mxu0 %v1834_v46  ;;  %995 = vmatprep.mubr.bf16.mxu0 %v1547_v0  ;;  %v785_v0 = vld [vmem:[#allocation7 + $0x10] sm:$0xff] }
 0x2db   : > { %965 = vmatprep.subr.bf16.mxu0 %v1838_v48  ;;  %v1013_v46 = vrot.slane %v785_v0, %v1858_v60  ;;  %v1025_v47 = vrot.slane %v785_v0, %v1860_v62  ;;  %v1019_v48 = vrot.slane %v785_v0, %v1862_v63 }
 0x2de   : > { %966 = vmatpush1.bf16.msra.mxu0 %v1842_v49 }
 0x2df   : > { %967 = vmatprep.subr.bf16.mxu0 %v1845_v50  ;;  %v1035_v50 = vrot.slane %v785_v0, %v1864_v1 }
 0x2e2   : > { %968 = vmatpush1.bf16.msra.mxu0 %v1848_v51 }
 0x2e3   : > { %969 = vmatprep.subr.bf16.mxu0 %v1851_v52 }
 0x2e6   : > { %970 = vmatpush1.bf16.msra.mxu0 %v1854_v54 }
 0x2e7   : > { %971 = vmatprep.subr.bf16.mxu0 %v1903_v24 }
 0x2ea   : > { %972 = vmatpush1.bf16.msra.mxu0 %v1905_v26 }
 0x2eb   : > { %973 = vmatprep.subr.bf16.mxu0 %v1909_v27 }
 0x2ee   : > { %974 = vmatpush1.bf16.msra.mxu0 %v1911_v28 }
 0x2ef   : > { %975 = vmatprep.subr.bf16.mxu0 %v1915_v29 }
 0x2f2   : > { %976 = vmatpush1.bf16.msra.mxu0 %v1917_v30 }
 0x2f3   : > { %977 = vmatprep.subr.bf16.mxu0 %v1921_v36 }
 0x2f6   : > { %978 = vmatpush1.bf16.msra.mxu0 %v1923_v37 }
 0x2f9   : > { %996 = vmatmul.mubr.bf16.vlgmr.msra.gmra.mrb[4].mxu0 %v796_v35 }
 0x3cc   : > { %v997_v49 = vpop.f32.mrb[4].mxu0 }
 0x3cd   : > { %v1014_v51 = vmul.f32 %v1013_v46, %v997_v49  ;;  %v999_v52 = vpop.f32.mrb[5].mxu0 }
 0x3ce   : > { %v1026_v54 = vmul.f32 %v1025_v47, %v999_v52  ;;  %v1030_v53 = vmul.f32 %v999_v52, %v997_v49  ;;  %v1001_v55 = vpop.f32.mrb[6].mxu0 }
 0x3cf   : > { %v1020_v56 = vadd.f32 %v1019_v48, %v1014_v51  ;;  %v1015_v58 = vmul.f32 %v1013_v46, %v1001_v55  ;;  %v1003_v59 = vpop.f32.mrb[7].mxu0 }
 0x3d0   : > { %v1036_v57 = vmul.f32 %v1035_v50, %v1030_v53  ;;  %v1027_v60 = vmul.f32 %v1025_v47, %v1003_v59  ;;  %v1031_v62 = vmul.f32 %v1003_v59, %v1001_v55 }
 0x3d1   : > { %v1028_v63 = vadd.f32 %v1026_v54, %v1020_v56  ;;  %v1021_v61 = vadd.f32 %v1019_v48, %v1015_v58 }
 0x3d2   : > { %v1037_v1 = vmul.f32 %v1035_v50, %v1031_v62 }
 0x3d3   : > { %v1038_v2 = vadd.f32 %v1036_v57, %v1028_v63  ;;  %v1029_v3 = vadd.f32 %v1027_v60, %v1021_v61 }
 0x3d5   : > { %1040 = vst [vmem:[%s217_s18] sm:$0xff] %v1038_v2  ;;  %v1039_v24 = vadd.f32 %v1037_v1, %v1029_v3 }
 0x3d7   : > { %1041 = vst [vmem:[%s217_s18 + $0x8] sm:$0xff] %v1039_v24 }
 0x3d8   : > { %1483 = shalt.err (!%p1480_p1)
}
 0x3d9   : > { %s1484_s10 = scalar_lea.hbm %s1977_s27, 256  ;;  %s1488_s26 = scalar_lea.hbm %s2024_s3, 512 }
 0x3da   : > { %p1485_p13 = scmp.ne.s32.totalorder %s1977_s27, %s1484_s10  ;;  %p1489_p4 = scmp.lt.u32.totalorder %s1977_s27, %s2024_s3 }
 0x3db   : > { %p1490_p5 = scmp.lt.u32.totalorder %s1488_s26, %s1484_s10  ;;  %p1492_p11 = scmp.lt.u32.totalorder %s1484_s10, %s1977_s27 }
 0x3dc   : > { %p1486_p6 = pnand %p1485_p13, %p2038_p0 }
 0x3dd   : > { %p1491_p8 = por %p1490_p5, %p1489_p4 }
 0x3de   : > { %p1487_p10 = pneg %p1486_p6 }
 0x3df   : > { %p1493_p2 = por %p1492_p11, %p1491_p8 }
 0x3e1   : > { %p1494_p3 = pnand %p1493_p2, %p1487_p10 }
 0x3e3   : > { %1497 = shalt.err (!%p1494_p3)
}
 0x3e4   : > { %s1549_s28 = smov 128   ;;  %s1550_s18 = smov 8  }
 0x3e5   : > { %1250 = dma.vmem_to_hbm [thread:$0]  (%p2038_p0), %s1972_s20, 256, %s1977_s27, %s1043_s22, %s1549_s28, %s1549_s28, %s1550_s18  }
 0x3e6 PF: > { %s1071_s7 = sand.u32 1, %s1528_s12   ;;  %p2039_p7 = scmp.ne.s32.totalorder %s2029_s19, 0 }
 0x3e7   : > { %p2040_p9 = scmp.ge.s32.totalorder %s1540_s15, 2  ;;  %s1072_s8 = scalar_lea.sflag [#allocation4], %s1071_s7 }
 0x3e9   : > { %p1264_p12 = pnand %p2040_p9, %p2039_p7 }
 0x3eb   : > { %1523 = dma.done.wait (!%p1264_p12), %s1072_s8, 256  }
 0x3ec   : > { %1525 = vsyncadd (!%p1264_p12), %s1072_s8, 4294967040  ;;  %p17_p1 = scmp.ge.s32.totalorder %s1687_s23, 4   ;;  %s2041_s12 = smov %s1532_s13 }
 0x3ed   : > { %s2042_s13 = smov %s1536_s14  ;;  %s2043_s14 = smov %s1703_s9 }
 0x3ee   : > { %s2044_s15 = smov %s1687_s23  ;;  %19 = sbr.rel (!%p17_p1) target bundleno = 6 (0x6), region = 89 }
 0x3f5   :  { %1077 = vsyncpa [#allocation3], 1 }
 0x3f6   :  { %1079 = vsyncpa [#allocation3 + $0x1], 1 }
 0x3f7   :  { %1080 = vsyncpa [#allocation6], 1 }
 0x3f8   :  { %1081 = vsyncpa [#allocation4], 1 }
 0x3f9   :  { %1083 = vsyncpa [#allocation4 + $0x1], 1 }

// kernel: tpu_custom_call.1
= control target key start
LH: loop header
LB: loop body
LE: loop exit
PB: predicated region body
PF: predicated region fallthrough
CT: control target
= control target key end

     0   :  { %8 = vsyncpa [#allocation3], 0  ;;  %s2021_s0 = inlined_call_operand.hbm [shape: f32[32,128], index: 0, kind: input, shape index: {}]   ;;  %s2022_s1 = inlined_call_operand.hbm [shape: bf16[3,128,256], index: 1, kind: input, shape index: {}]   ;;  %s2023_s2 = inlined_call_operand.hbm [shape: f32[3,8,128], index: 2, kind: input, shape index: {}]   ;;  %s2024_s3 = inlined_call_operand.hbm [shape: f32[32,128], index: 3, kind: output, shape index: {}]  }
   0x1   :  { %10 = vsyncpa [#allocation3 + $0x1], 0 }
   0x2   :  { %11 = vsyncpa [#allocation6], 0 }
   0x3   :  { %12 = vsyncpa [#allocation4], 0 }
   0x4   :  { %14 = vsyncpa [#allocation4 + $0x1], 0  ;;  %s1571_s12 = smov 0   ;;  %s1573_s13 = smov 0  }
   0x5   :  { %s1575_s14 = smov 0   ;;  %s1577_s15 = smov 0  }
   0x6 LB: > { %s1592_s16 = sadd.s32 4294967295, %s1540_s15   ;;  %s1148_s17 = sadd.s32 4294967294, %s1540_s15   ;;  %s1540_s15 = sphi %s1577_s15, %s2044_s15   ;;  %s1536_s14 = sphi %s1575_s14, %s2043_s14   ;;  %s1532_s13 = sphi %s1573_s13, %s2042_s13   ;;  %s1528_s12 = sphi %s1571_s12, %s2041_s12  }
   0x7   : > { %p40_p0 = scmp.ne.s32.totalorder %s1532_s13, %s1528_s12  ;;  %p2025_p1 = scmp.eq.s32.totalorder %s1592_s16, 0 }
   0x8   : > { %p112_p3 = scmp.eq.s32.totalorder %s1148_s17, 1  ;;  %p1149_p5 = scmp.ge.s32.totalorder %s1540_s15, 1 }
   0x9   : > { %p1601_p4 = por %p2025_p1, %p40_p0  ;;  %p119_p7 = scmp.lt.s32.totalorder %s1540_s15, 3 }
   0xa   : > { %p1606_p6 = por %p112_p3, %p40_p0  ;;  %s1542_s21 = smov [#allocation5]  }
   0xb   : > { %s2028_s18 = scalar_select %p1601_p4, 1, 0 }
   0xc   : > { %s2029_s19 = scalar_select %p1606_p6, 1, 0 }
   0xd   : > { %p1611_p8 = pnand %p1149_p5, %p119_p7  ;;  %s131_s22 = sshll.u32 %s1542_s21, 4  ;;  %s1615_s22 = int_to_ptr.vmem [resolvable:$true] %s131_s22 }
   0xe   : > { %s1543_s24 = smov [#allocation7]   ;;  %s1384_s28 = scalar_lea.hbm %s2022_s1, 6144 }
   0xf   : > { %p1252_p9 = pneg %p1611_p8  ;;  %s144_s25 = sshll.u32 %s1543_s24, 4  ;;  %s1626_s25 = int_to_ptr.vmem [resolvable:$true] %s144_s25 }
  0x10   : > { %p1385_p12 = scmp.ne.s32.totalorder %s2022_s1, %s1384_s28  ;;  %p1391_p5 = scmp.lt.u32.totalorder %s1384_s28, %s2022_s1 }
  0x11   : > { %p1622_p11 = pnand %p1252_p9, %p2025_p1 }
  0x13   : > { %p1386_p13 = pneg %p1622_p11 }
  0x15   : > { %p1387_p0 = pnand %p1386_p13, %p1385_p12 }
  0x17   : > { %p1388_p3 = pneg %p1387_p0 }
  0x19   : > { %p1393_p7 = pnand %p1391_p5, %p1388_p3 }
  0x1b   : > { %1396 = shalt.err (!%p1393_p7)
}
  0x1c   : > { %s1397_s6 = scalar_lea.vmem %s1615_s22, 6144  ;;  %p1405_p2 = scmp.lt.s32.totalorder %s1615_s22, %s1615_s22 }
  0x1d   : > { %p1398_p9 = scmp.ne.s32.totalorder %s1615_s22, %s1397_s6  ;;  %p1406_p12 = scmp.lt.s32.totalorder %s1397_s6, %s1397_s6 }
  0x1f   : > { %p1400_p10 = pnand %p1398_p9, %p1386_p13  ;;  %p1407_p0 = por %p1406_p12, %p1405_p2 }
  0x21   : > { %p1401_p1 = pneg %p1400_p10 }
  0x23   : > { %p1408_p6 = pnand %p1407_p0, %p1401_p1 }
  0x25   : > { %1411 = shalt.err (!%p1408_p6)
}
  0x26   : > { %s1544_s7 = smov 128   ;;  %s1545_s8 = smov 8  }
  0x27   : > { %1255 = dma.hbm_to_vmem [thread:$0]  (!%p1622_p11), %s2022_s1, 6144, %s1615_s22, [#allocation6], %s1544_s7, %s1544_s7, %s1545_s8  }
  0x28   : > { %s1412_s21 = scalar_lea.hbm %s2023_s2, 384 }
  0x29   : > { %p1413_p1 = scmp.ne.s32.totalorder %s2023_s2, %s1412_s21  ;;  %p1419_p10 = scmp.lt.u32.totalorder %s1412_s21, %s2023_s2 }
  0x2b   : > { %p1415_p2 = pnand %p1413_p1, %p1386_p13 }
  0x2d   : > { %p1416_p6 = pneg %p1415_p2 }
  0x2f   : > { %p1421_p3 = pnand %p1419_p10, %p1416_p6 }
  0x31   : > { %1424 = shalt.err (!%p1421_p3)
}
  0x32   : > { %s1425_s22 = scalar_lea.vmem %s1626_s25, 384  ;;  %p1433_p12 = scmp.lt.s32.totalorder %s1626_s25, %s1626_s25 }
  0x33   : > { %p1426_p5 = scmp.ne.s32.totalorder %s1626_s25, %s1425_s22  ;;  %p1434_p0 = scmp.lt.s32.totalorder %s1425_s22, %s1425_s22 }
  0x35   : > { %p1428_p7 = pnand %p1426_p5, %p1386_p13  ;;  %p1435_p1 = por %p1434_p0, %p1433_p12 }
  0x37   : > { %p1429_p9 = pneg %p1428_p7 }
  0x39   : > { %p1436_p2 = pnand %p1435_p1, %p1429_p9 }
  0x3b   : > { %1439 = shalt.err (!%p1436_p2)
}
  0x3c   : > { %1258 = dma.hbm_to_vmem [thread:$0]  (!%p1622_p11), %s2023_s2, 384, %s1626_s25, [#allocation6], %s1544_s7, %s1544_s7, %s1545_s8  }
  0x3d   : > { %s1687_s23 = sadd.s32 1, %s1540_s15   ;;  %s27_s4 = sadd.s32 1, %s1536_s14 }
  0x3e   : > { %s24_s5 = ssub.s32 %s1540_s15, %s1687_s23  ;;  %p34_p13 = scmp.ne.s32.totalorder %s1536_s14, %s1532_s13 }
  0x3f   : > { %p25_p6 = scmp.eq.s32.totalorder %s24_s5, 0  ;;  %p35_p10 = scmp.eq.s32.totalorder %s1540_s15, 0 }
  0x40   : > { %p2032_p3 = scmp.eq.s32.totalorder %s1592_s16, 1  ;;  %p1269_p7 = scmp.lt.s32.totalorder %s1540_s15, 2 }
  0x41   : > { %s1703_s9 = scalar_select %p25_p6, %s1536_s14, %s27_s4  }
  0x42   : > { %p1697_p5 = por %p2032_p3, %p34_p13  ;;  %p36_p9 = por %p35_p10, %p34_p13 }
  0x43   : > { %s158_s10 = sand.u32 1, %s1536_s14   ;;  %s1214_s25 = sshll.u32 %s1540_s15, 8 }
  0x44   : > { %s2033_s6 = scalar_select %p1697_p5, 1, 0 }
  0x45   : > { %s1153_s11 = sshll.u32 %s158_s10, 4  ;;  %s1710_s24 = scalar_lea.hbm %s2021_s0, %s1214_s25 }
  0x46   : > { %s162_s26 = scalar_lea.vmem [#allocation2], %s1153_s11  ;;  %p1714_p11 = pnand %p1269_p7, %p36_p9 }
  0x47   : > { %s169_s27 = sshll.u32 %s162_s26, 4  ;;  %s1718_s22 = scalar_lea.sflag [#allocation3], %s158_s10  ;;  %s1712_s27 = int_to_ptr.vmem [resolvable:$true] %s169_s27 }
  0x48   : > { %s1440_s29 = scalar_lea.hbm %s1710_s24, 256  ;;  %p1442_p0 = pneg %p1714_p11 }
  0x49   : > { %p1441_p12 = scmp.ne.s32.totalorder %s1710_s24, %s1440_s29  ;;  %s1445_s5 = scalar_lea.hbm %s2021_s0, 512 }
  0x4a   : > { %p1446_p13 = scmp.lt.u32.totalorder %s1710_s24, %s2021_s0  ;;  %p1447_p6 = scmp.lt.u32.totalorder %s1445_s5, %s1440_s29 }
  0x4b   : > { %p1443_p1 = pnand %p1442_p0, %p1441_p12  ;;  %p1449_p3 = scmp.lt.u32.totalorder %s1440_s29, %s1710_s24 }
  0x4c   : > { %p1448_p10 = por %p1447_p6, %p1446_p13 }
  0x4d   : > { %p1444_p2 = pneg %p1443_p1 }
  0x4e   : > { %p1450_p7 = por %p1449_p3, %p1448_p10 }
  0x50   : > { %p1451_p9 = pnand %p1450_p7, %p1444_p2 }
  0x52   : > { %1454 = shalt.err (!%p1451_p9)
}
  0x53   : > { %s1455_s10 = scalar_lea.vmem %s1712_s27, 256  ;;  %s1546_s17 = smov [#allocation2]  }
  0x54   : > { %p1456_p12 = scmp.ne.s32.totalorder %s1712_s27, %s1455_s10  ;;  %s1460_s21 = sshll.u32 %s1546_s17, 4  ;;  %s1461_s21 = int_to_ptr.vmem [resolvable:$false] %s1460_s21 }
  0x55   : > { %s1462_s26 = scalar_lea.vmem %s1461_s21, 512  ;;  %p1463_p4 = scmp.lt.s32.totalorder %s1712_s27, %s1461_s21 }
  0x56   : > { %p1458_p1 = pnand %p1456_p12, %p1442_p0  ;;  %p1464_p13 = scmp.lt.s32.totalorder %s1462_s26, %s1455_s10 }
  0x58   : > { %p1459_p5 = pneg %p1458_p1  ;;  %p1465_p6 = por %p1464_p13, %p1463_p4 }
  0x5a   : > { %p1466_p10 = pnand %p1465_p6, %p1459_p5 }
  0x5c   : > { %1469 = shalt.err (!%p1466_p10)
}
  0x5d   : > { %1262 = dma.hbm_to_vmem [thread:$0]  (!%p1714_p11), %s1710_s24, 256, %s1712_s27, %s1718_s22, %s1544_s7, %s1544_s7, %s1545_s8  }
  0x5e   : > { %181 = sbr.rel (%p1611_p8) target bundleno = 998 (0x3e6), region = 32  ;;  %s1752_s29 = sand.u32 (!%p1611_p8), 1, %s1532_s13  }
  0x5f   : > { %s1157_s30 = sshll.u32 (!%p1611_p8), %s1752_s29, 4  ;;  %s184_s4 = scalar_lea.sflag (!%p1611_p8), [#allocation3], %s1752_s29 }
  0x60   : > { %s1758_s28 = scalar_lea.vmem (!%p1611_p8), [#allocation2], %s1157_s30  ;;  %p2035_p4 = scmp.ne.s32.totalorder (!%p1611_p8), %s2028_s18, 0 }
  0x65   : > { %1515 = dma.done.wait (%p2035_p4), %s184_s4, 256  }
  0x66   : > { %1517 = vsyncadd (%p2035_p4), %s184_s4, 4294967040  ;;  %p2036_p5 = scmp.eq.s32.totalorder %s1592_s16, 0 }
  0x68   : > { %1519 = dma.done.wait (%p2036_p5), [#allocation6], 6528   ;;  %p2037_p8 = pmov %p2036_p5 }
  0x69   : > { %v1547_v0 = vmov 0   ;;  %v1312_v1 = vld [vmem:[#allocation5 + $0x4] ss:$8 sps:$4 sm:$0xff]   ;;  %v1314_v2 = vld [vmem:[#allocation5] ss:$8 sps:$4 sm:$0xff]   ;;  %v464_v58 = vlaneseq  ;;  %s217_s18 = scalar_lea.vmem [#allocation8], %s1157_s30 }
  0x6a   : > { %1521 = vsyncadd (%p2037_p8), [#allocation6], 4294960768  ;;  %406 = vmatprep.mubr.bf16.mxu0 %v1547_v0  ;;  %363 = vmatprep.mubr.bf16.mxu1 %v1547_v0  ;;  %v1315_v3 = vld [vmem:[#allocation5 + $0x14] ss:$8 sps:$4 sm:$0xff]   ;;  %v1770_v4 = vld [vmem:[#allocation5 + $0x10] ss:$8 sps:$4 sm:$0xff]  }
  0x6b   : > { %374 = vmatprep.subr.bf16.mxu0 %v1312_v1  ;;  %331 = vmatprep.subr.bf16.mxu1 %v1312_v1  ;;  %v1318_v5 = vld [vmem:[#allocation5 + $0x24] ss:$8 sps:$4 sm:$0xff]   ;;  %v1773_v6 = vld [vmem:[#allocation5 + $0x20] ss:$8 sps:$4 sm:$0xff]   ;;  %v1321_v7 = vld [vmem:[#allocation5 + $0x34] ss:$8 sps:$4 sm:$0xff]  }
  0x6c   : > { %375 = vmatpush1.bf16.msra.mxu0 %v1314_v2  ;;  %332 = vmatpush1.bf16.msra.mxu1 %v1314_v2  ;;  %v1323_v8 = vld [vmem:[#allocation5 + $0x30] ss:$8 sps:$4 sm:$0xff]   ;;  %v1324_v9 = vld [vmem:[#allocation5 + $0x44] ss:$8 sps:$4 sm:$0xff]   ;;  %v1326_v10 = vld [vmem:[#allocation5 + $0x40] ss:$8 sps:$4 sm:$0xff]  }
  0x6d   : > { %376 = vmatprep.subr.bf16.mxu0 %v1315_v3  ;;  %333 = vmatprep.subr.bf16.mxu1 %v1315_v3  ;;  %v1327_v11 = vld [vmem:[#allocation5 + $0x54] ss:$8 sps:$4 sm:$0xff]   ;;  %v1329_v12 = vld [vmem:[#allocation5 + $0x50] ss:$8 sps:$4 sm:$0xff]   ;;  %v1330_v15 = vld [vmem:[#allocation5 + $0x64] ss:$8 sps:$4 sm:$0xff]  }
  0x6e   : > { %v221_v13 = vld [vmem:[%s1758_s28] sm:$0xff]  ;;  %v222_v14 = vld [vmem:[%s1758_s28 + $0x8] sm:$0xff]  ;;  %v465_v59 = vshrl.u32 %v464_v58, 7  ;;  %s1056_s20 = sshll.u32 %s217_s18, 4  ;;  %s1215_s7 = sshll.u32 %s1592_s16, 8  ;;  %s1972_s20 = int_to_ptr.vmem [resolvable:$true] %s1056_s20 }
  0x6f   : > { %v1332_v16 = vld [vmem:[#allocation5 + $0x60] ss:$8 sps:$4 sm:$0xff]   ;;  %v240_v17 = vpack.c.bf16 %v222_v14, %v221_v13  ;;  %v1333_v18 = vld [vmem:[#allocation5 + $0x74] ss:$8 sps:$4 sm:$0xff]   ;;  %v1335_v21 = vld [vmem:[#allocation5 + $0x70] ss:$8 sps:$4 sm:$0xff]   ;;  %s1977_s27 = scalar_lea.hbm %s2024_s3, %s1215_s7 }
  0x70   : > { %377 = vmatpush1.bf16.msra.mxu0 %v1770_v4  ;;  %334 = vmatpush1.bf16.msra.mxu1 %v1770_v4  ;;  %v1780_v24 = vld [vmem:[#allocation5 + $0x84] ss:$8 sps:$4 sm:$0xff]   ;;  %v1782_v26 = vld [vmem:[#allocation5 + $0x80] ss:$8 sps:$4 sm:$0xff]   ;;  %v1785_v27 = vld [vmem:[#allocation5 + $0x94] ss:$8 sps:$4 sm:$0xff]  }
  0x71   : > { %378 = vmatprep.subr.bf16.mxu0 %v1318_v5  ;;  %335 = vmatprep.subr.bf16.mxu1 %v1318_v5  ;;  %v241_v19 = vunpack.c.l.bf16 %v240_v17  ;;  %v242_v20 = vunpack.c.h.bf16 %v240_v17  ;;  %v1789_v28 = vld [vmem:[#allocation5 + $0x90] ss:$8 sps:$4 sm:$0xff]   ;;  %v1792_v29 = vld [vmem:[#allocation5 + $0xa4] ss:$8 sps:$4 sm:$0xff]   ;;  %v1797_v30 = vld [vmem:[#allocation5 + $0xa0] ss:$8 sps:$4 sm:$0xff]  }
  0x72   : > { %v1803_v36 = vld [vmem:[#allocation5 + $0xb4] ss:$8 sps:$4 sm:$0xff]   ;;  %v1805_v37 = vld [vmem:[#allocation5 + $0xb0] ss:$8 sps:$4 sm:$0xff]   ;;  %v1809_v38 = vld [vmem:[#allocation5 + $0xc4] ss:$8 sps:$4 sm:$0xff]  }
  0x73   : > { %v243_v22 = vsub.f32 %v221_v13, %v241_v19  ;;  %v244_v23 = vsub.f32 %v222_v14, %v242_v20  ;;  %v1811_v39 = vld [vmem:[#allocation5 + $0xc0] ss:$8 sps:$4 sm:$0xff]   ;;  %v1815_v40 = vld [vmem:[#allocation5 + $0xd4] ss:$8 sps:$4 sm:$0xff]   ;;  %v1817_v41 = vld [vmem:[#allocation5 + $0xd0] ss:$8 sps:$4 sm:$0xff]  }
  0x74   : > { %379 = vmatpush1.bf16.msra.mxu0 %v1773_v6  ;;  %336 = vmatpush1.bf16.msra.mxu1 %v1773_v6  ;;  %v1821_v42 = vld [vmem:[#allocation5 + $0xe4] ss:$8 sps:$4 sm:$0xff]   ;;  %v1823_v43 = vld [vmem:[#allocation5 + $0xe0] ss:$8 sps:$4 sm:$0xff]   ;;  %v1827_v44 = vld [vmem:[#allocation5 + $0xf4] ss:$8 sps:$4 sm:$0xff]  }
  0x75   : > { %380 = vmatprep.subr.bf16.mxu0 %v1321_v7  ;;  %337 = vmatprep.subr.bf16.mxu1 %v1321_v7  ;;  %v245_v25 = vpack.c.bf16 %v244_v23, %v243_v22  ;;  %v1829_v45 = vld [vmem:[#allocation5 + $0xf0] ss:$8 sps:$4 sm:$0xff]   ;;  %v1834_v46 = vld [vmem:[#allocation5 + $0x100] ss:$8 sps:$4 sm:$0xff]   ;;  %v1836_v47 = vld [vmem:[#allocation5 + $0x104] ss:$8 sps:$4 sm:$0xff]  }
  0x76   : > { %v1838_v48 = vld [vmem:[#allocation5 + $0x114] ss:$8 sps:$4 sm:$0xff]   ;;  %v1842_v49 = vld [vmem:[#allocation5 + $0x110] ss:$8 sps:$4 sm:$0xff]   ;;  %v1845_v50 = vld [vmem:[#allocation5 + $0x124] ss:$8 sps:$4 sm:$0xff]  }
  0x77   : > { %v246_v31 = vunpack.c.l.bf16 %v245_v25  ;;  %v247_v32 = vunpack.c.h.bf16 %v245_v25  ;;  %v1848_v51 = vld [vmem:[#allocation5 + $0x120] ss:$8 sps:$4 sm:$0xff]   ;;  %v1851_v52 = vld [vmem:[#allocation5 + $0x134] ss:$8 sps:$4 sm:$0xff]   ;;  %v1854_v54 = vld [vmem:[#allocation5 + $0x130] ss:$8 sps:$4 sm:$0xff]  }
  0x78   : > { %381 = vmatpush1.bf16.msra.mxu0 %v1323_v8  ;;  %338 = vmatpush1.bf16.msra.mxu1 %v1323_v8  ;;  %v1858_v60 = vsub.s32 1, %v465_v59  ;;  %v239_v61 = vld [vmem:[#allocation7] sm:$0xff]  ;;  %v1860_v62 = vsub.s32 2, %v465_v59  ;;  %v1862_v63 = vsub.s32 0, %v465_v59  ;;  %s1043_s22 = scalar_lea.sflag [#allocation4], %s1752_s29  ;;  %s1470_s5 = scalar_lea.vmem %s1972_s20, 256 }
  0x79   : > { %382 = vmatprep.subr.bf16.mxu0 %v1324_v9  ;;  %339 = vmatprep.subr.bf16.mxu1 %v1324_v9  ;;  %v248_v33 = vsub.f32 %v243_v22, %v246_v31  ;;  %v249_v34 = vsub.f32 %v244_v23, %v247_v32  ;;  %p1471_p11 = scmp.ne.s32.totalorder %s1972_s20, %s1470_s5  ;;  %p2038_p0 = scmp.ne.s32.totalorder %s2033_s6, 0 }
  0x7a   : > { %s1548_s16 = smov [#allocation8]  }
  0x7b   : > { %v250_v35 = vpack.c.bf16 %v249_v34, %v248_v33  ;;  %p1472_p2 = pnand %p1471_p11, %p2038_p0  ;;  %s1474_s11 = sshll.u32 %s1548_s16, 4  ;;  %s1475_s11 = int_to_ptr.vmem [resolvable:$false] %s1474_s11 }
  0x7c   : > { %383 = vmatpush1.bf16.msra.mxu0 %v1326_v10  ;;  %340 = vmatpush1.bf16.msra.mxu1 %v1326_v10  ;;  %s1476_s25 = scalar_lea.vmem %s1475_s11, 512  ;;  %p1477_p7 = scmp.lt.s32.totalorder %s1972_s20, %s1475_s11 }
  0x7d   : > { %384 = vmatprep.subr.bf16.mxu0 %v1327_v11  ;;  %341 = vmatprep.subr.bf16.mxu1 %v1327_v11  ;;  %p1473_p3 = pneg %p1472_p2  ;;  %p1478_p9 = scmp.lt.s32.totalorder %s1476_s25, %s1470_s5 }
  0x7f   : > { %p1479_p12 = por %p1478_p9, %p1477_p7 }
  0x80   : > { %385 = vmatpush1.bf16.msra.mxu0 %v1329_v12  ;;  %342 = vmatpush1.bf16.msra.mxu1 %v1329_v12 }
  0x81   : > { %386 = vmatprep.subr.bf16.mxu0 %v1330_v15  ;;  %343 = vmatprep.subr.bf16.mxu1 %v1330_v15  ;;  %p1480_p1 = pnand %p1479_p12, %p1473_p3 }
  0x84   : > { %387 = vmatpush1.bf16.msra.mxu0 %v1332_v16  ;;  %344 = vmatpush1.bf16.msra.mxu1 %v1332_v16 }
  0x85   : > { %388 = vmatprep.subr.bf16.mxu0 %v1333_v18  ;;  %345 = vmatprep.subr.bf16.mxu1 %v1333_v18 }
  0x88   : > { %389 = vmatpush1.bf16.msra.mxu0 %v1335_v21  ;;  %346 = vmatpush1.bf16.msra.mxu1 %v1335_v21 }
  0x89   : > { %417 = vmatprep.subr.bf16.mxu0 %v1312_v1  ;;  %604 = vmatprep.subr.bf16.mxu1 %v1780_v24  ;;  %v1864_v1 = vsub.s32 3, %v465_v59 }
  0x8b   : > { %407 = vmatmul.mubr.bf16.vlgmr.msra.gmra.mrb[0].mxu0 %v240_v17  ;;  %364 = vmatmul.mubr.bf16.vlgmr.msra.gmra.mrb[0].mxu1 %v245_v25 }
  0x8c   : > { %418 = vmatpush1.bf16.msra.mxu0 %v1314_v2  ;;  %449 = vmatprep.mubr.bf16.mxu0 %v1547_v0  ;;  %v467_v2 = vrot.slane %v239_v61, %v1858_v60 }
  0x8d   : > { %419 = vmatprep.subr.bf16.mxu0 %v1315_v3  ;;  %605 = vmatpush1.bf16.msra.mxu1 %v1782_v26 }
  0x8e   : > { %606 = vmatprep.subr.bf16.mxu1 %v1785_v27  ;;  %636 = vmatprep.mubr.bf16.mxu1 %v1547_v0 }
  0x90   : > { %420 = vmatpush1.bf16.msra.mxu0 %v1770_v4  ;;  %v479_v4 = vrot.slane %v239_v61, %v1860_v62 }
  0x91   : > { %421 = vmatprep.subr.bf16.mxu0 %v1318_v5  ;;  %607 = vmatpush1.bf16.msra.mxu1 %v1789_v28 }
  0x92   : > { %608 = vmatprep.subr.bf16.mxu1 %v1792_v29 }
  0x94   : > { %422 = vmatpush1.bf16.msra.mxu0 %v1773_v6  ;;  %v473_v6 = vrot.slane %v239_v61, %v1862_v63 }
  0x95   : > { %423 = vmatprep.subr.bf16.mxu0 %v1321_v7  ;;  %609 = vmatpush1.bf16.msra.mxu1 %v1797_v30 }
  0x96   : > { %610 = vmatprep.subr.bf16.mxu1 %v1803_v36 }
  0x98   : > { %424 = vmatpush1.bf16.msra.mxu0 %v1323_v8 }
  0x99   : > { %425 = vmatprep.subr.bf16.mxu0 %v1324_v9  ;;  %611 = vmatpush1.bf16.msra.mxu1 %v1805_v37  ;;  %v489_v9 = vrot.slane %v239_v61, %v1864_v1 }
  0x9a   : > { %612 = vmatprep.subr.bf16.mxu1 %v1809_v38 }
  0x9c   : > { %426 = vmatpush1.bf16.msra.mxu0 %v1326_v10 }
  0x9d   : > { %427 = vmatprep.subr.bf16.mxu0 %v1327_v11  ;;  %613 = vmatpush1.bf16.msra.mxu1 %v1811_v39 }
  0x9e   : > { %614 = vmatprep.subr.bf16.mxu1 %v1815_v40 }
  0xa0   : > { %428 = vmatpush1.bf16.msra.mxu0 %v1329_v12 }
  0xa1   : > { %429 = vmatprep.subr.bf16.mxu0 %v1330_v15  ;;  %615 = vmatpush1.bf16.msra.mxu1 %v1817_v41 }
  0xa2   : > { %616 = vmatprep.subr.bf16.mxu1 %v1821_v42 }
  0xa4   : > { %430 = vmatpush1.bf16.msra.mxu0 %v1332_v16 }
  0xa5   : > { %431 = vmatprep.subr.bf16.mxu0 %v1333_v18  ;;  %617 = vmatpush1.bf16.msra.mxu1 %v1823_v43 }
  0xa6   : > { %618 = vmatprep.subr.bf16.mxu1 %v1827_v44 }
  0xa8   : > { %432 = vmatpush1.bf16.msra.mxu0 %v1335_v21 }
  0xa9   : > { %619 = vmatpush1.bf16.msra.mxu1 %v1829_v45  ;;  %877 = vmatprep.subr.bf16.mxu0 %v1836_v47 }
  0xaa   : > { %647 = vmatprep.subr.bf16.mxu1 %v1780_v24 }
  0xab   : > { %450 = vmatmul.mubr.bf16.vlgmr.msra.gmra.mrb[0].mxu0 %v250_v35 }
  0xac   : > { %909 = vmatprep.mubr.bf16.mxu0 %v1547_v0  ;;  %878 = vmatpush1.bf16.msra.mxu0 %v1834_v46 }
  0xad   : > { %879 = vmatprep.subr.bf16.mxu0 %v1838_v48 }
  0xb0   : > { %880 = vmatpush1.bf16.msra.mxu0 %v1842_v49 }
  0xb1   : > { %881 = vmatprep.subr.bf16.mxu0 %v1845_v50 }
  0xb4   : > { %882 = vmatpush1.bf16.msra.mxu0 %v1848_v51 }
  0xb5   : > { %883 = vmatprep.subr.bf16.mxu0 %v1851_v52 }
  0xb8   : > { %884 = vmatpush1.bf16.msra.mxu0 %v1854_v54 }
 0x15e   : > { %v365_v53 = vpop.f32.mrb[0].mxu1 }
 0x15f   : > { %v367_v55 = vpop.f32.mrb[1].mxu1 }
 0x160   : > { %v369_v56 = vpop.f32.mrb[2].mxu1 }
 0x161   : > { %v371_v57 = vpop.f32.mrb[3].mxu1 }
 0x17e   : > { %v451_v3 = vpop.f32.mrb[0].mxu0 }
 0x17f   : > { %v1216_v5 = vadd.f32 %v451_v3, %v365_v53  ;;  %v453_v7 = vpop.f32.mrb[1].mxu0 }
 0x180   : > { %v1217_v8 = vadd.f32 %v453_v7, %v367_v55  ;;  %v455_v10 = vpop.f32.mrb[2].mxu0 }
 0x181   : > { %v468_v11 = vmul.f32 %v1216_v5, %v467_v2  ;;  %v1218_v12 = vadd.f32 %v455_v10, %v369_v56  ;;  %v457_v13 = vpop.f32.mrb[3].mxu0 }
 0x182   : > { %v480_v14 = vmul.f32 %v1217_v8, %v479_v4  ;;  %v484_v15 = vmul.f32 %v1217_v8, %v1216_v5  ;;  %v1219_v16 = vadd.f32 %v457_v13, %v371_v57 }
 0x183   : > { %v474_v17 = vadd.f32 %v473_v6, %v468_v11  ;;  %v469_v18 = vmul.f32 %v1218_v12, %v467_v2 }
 0x184   : > { %v490_v19 = vmul.f32 %v489_v9, %v484_v15  ;;  %v481_v20 = vmul.f32 %v1219_v16, %v479_v4  ;;  %v485_v21 = vmul.f32 %v1219_v16, %v1218_v12 }
 0x185   : > { %v482_v22 = vadd.f32 %v480_v14, %v474_v17  ;;  %v475_v23 = vadd.f32 %v473_v6, %v469_v18 }
 0x186   : > { %v491_v25 = vmul.f32 %v489_v9, %v485_v21 }
 0x187   : > { %v492_v31 = vadd.f32 %v490_v19, %v482_v22  ;;  %v483_v32 = vadd.f32 %v481_v20, %v475_v23 }
 0x189   : > { %v493_v33 = vadd.f32 %v491_v25, %v483_v32 }
 0x18b   : > { %v513_v34 = vpack.c.bf16 %v493_v33, %v492_v31 }
 0x18d   : > { %v515_v35 = vunpack.c.h.bf16 %v513_v34  ;;  %v514_v53 = vunpack.c.l.bf16 %v513_v34 }
 0x18f   : > { %v517_v55 = vsub.f32 %v493_v33, %v515_v35  ;;  %v516_v56 = vsub.f32 %v492_v31, %v514_v53 }
 0x191   : > { %v518_v58 = vpack.c.bf16 %v517_v55, %v516_v56 }
 0x193   : > { %637 = vmatmul.mubr.bf16.vlgmr.msra.gmra.mrb[4].mxu1 %v518_v58  ;;  %v519_v59 = vunpack.c.l.bf16 %v518_v58  ;;  %v520_v57 = vunpack.c.h.bf16 %v518_v58 }
 0x194   : > { %648 = vmatpush1.bf16.msra.mxu1 %v1782_v26  ;;  %679 = vmatprep.mubr.bf16.mxu1 %v1547_v0 }
 0x195   : > { %649 = vmatprep.subr.bf16.mxu1 %v1785_v27  ;;  %v521_v61 = vsub.f32 %v516_v56, %v519_v59  ;;  %v522_v2 = vsub.f32 %v517_v55, %v520_v57 }
 0x197   : > { %v523_v3 = vpack.c.bf16 %v522_v2, %v521_v61 }
 0x198   : > { %650 = vmatpush1.bf16.msra.mxu1 %v1789_v28 }
 0x199   : > { %651 = vmatprep.subr.bf16.mxu1 %v1792_v29 }
 0x19c   : > { %652 = vmatpush1.bf16.msra.mxu1 %v1797_v30 }
 0x19d   : > { %653 = vmatprep.subr.bf16.mxu1 %v1803_v36 }
 0x1a0   : > { %654 = vmatpush1.bf16.msra.mxu1 %v1805_v37 }
 0x1a1   : > { %655 = vmatprep.subr.bf16.mxu1 %v1809_v38 }
 0x1a4   : > { %656 = vmatpush1.bf16.msra.mxu1 %v1811_v39 }
 0x1a5   : > { %657 = vmatprep.subr.bf16.mxu1 %v1815_v40 }
 0x1a8   : > { %658 = vmatpush1.bf16.msra.mxu1 %v1817_v41 }
 0x1a9   : > { %659 = vmatprep.subr.bf16.mxu1 %v1821_v42 }
 0x1ac   : > { %660 = vmatpush1.bf16.msra.mxu1 %v1823_v43 }
 0x1ad   : > { %661 = vmatprep.subr.bf16.mxu1 %v1827_v44 }
 0x1b0   : > { %662 = vmatpush1.bf16.msra.mxu1 %v1829_v45 }
 0x1b1   : > { %690 = vmatprep.subr.bf16.mxu1 %v1780_v24  ;;  %v1903_v24 = vld [vmem:[#allocation5 + $0x144] ss:$8 sps:$4 sm:$0xff]  }
 0x1b2   : > { %885 = vmatprep.subr.bf16.mxu0 %v1903_v24 }
 0x1b3   : > { %680 = vmatmul.mubr.bf16.vlgmr.msra.gmra.mrb[4].mxu1 %v513_v34 }
 0x1b4   : > { %691 = vmatpush1.bf16.msra.mxu1 %v1782_v26  ;;  %722 = vmatprep.mubr.bf16.mxu1 %v1547_v0  ;;  %v1905_v26 = vld [vmem:[#allocation5 + $0x140] ss:$8 sps:$4 sm:$0xff]  }
 0x1b5   : > { %692 = vmatprep.subr.bf16.mxu1 %v1785_v27  ;;  %886 = vmatpush1.bf16.msra.mxu0 %v1905_v26  ;;  %v1909_v27 = vld [vmem:[#allocation5 + $0x154] ss:$8 sps:$4 sm:$0xff]  }
 0x1b6   : > { %887 = vmatprep.subr.bf16.mxu0 %v1909_v27 }
 0x1b8   : > { %693 = vmatpush1.bf16.msra.mxu1 %v1789_v28  ;;  %v1911_v28 = vld [vmem:[#allocation5 + $0x150] ss:$8 sps:$4 sm:$0xff]  }
 0x1b9   : > { %694 = vmatprep.subr.bf16.mxu1 %v1792_v29  ;;  %888 = vmatpush1.bf16.msra.mxu0 %v1911_v28  ;;  %v1915_v29 = vld [vmem:[#allocation5 + $0x164] ss:$8 sps:$4 sm:$0xff]  }
 0x1ba   : > { %889 = vmatprep.subr.bf16.mxu0 %v1915_v29 }
 0x1bc   : > { %695 = vmatpush1.bf16.msra.mxu1 %v1797_v30  ;;  %v1917_v30 = vld [vmem:[#allocation5 + $0x160] ss:$8 sps:$4 sm:$0xff]  }
 0x1bd   : > { %696 = vmatprep.subr.bf16.mxu1 %v1803_v36  ;;  %890 = vmatpush1.bf16.msra.mxu0 %v1917_v30  ;;  %v1921_v36 = vld [vmem:[#allocation5 + $0x174] ss:$8 sps:$4 sm:$0xff]  }
 0x1be   : > { %891 = vmatprep.subr.bf16.mxu0 %v1921_v36 }
 0x1c0   : > { %697 = vmatpush1.bf16.msra.mxu1 %v1805_v37  ;;  %v1923_v37 = vld [vmem:[#allocation5 + $0x170] ss:$8 sps:$4 sm:$0xff]  }
 0x1c1   : > { %698 = vmatprep.subr.bf16.mxu1 %v1809_v38  ;;  %892 = vmatpush1.bf16.msra.mxu0 %v1923_v37  ;;  %v512_v38 = vld [vmem:[#allocation7 + $0x8] sm:$0xff] }
 0x1c2   : > { %920 = vmatprep.subr.bf16.mxu0 %v1836_v47 }
 0x1c4   : > { %699 = vmatpush1.bf16.msra.mxu1 %v1811_v39  ;;  %v740_v39 = vrot.slane %v512_v38, %v1858_v60 }
 0x1c5   : > { %700 = vmatprep.subr.bf16.mxu1 %v1815_v40  ;;  %v752_v40 = vrot.slane %v512_v38, %v1860_v62 }
 0x1c8   : > { %701 = vmatpush1.bf16.msra.mxu1 %v1817_v41  ;;  %v746_v41 = vrot.slane %v512_v38, %v1862_v63 }
 0x1c9   : > { %702 = vmatprep.subr.bf16.mxu1 %v1821_v42 }
 0x1cc   : > { %703 = vmatpush1.bf16.msra.mxu1 %v1823_v43  ;;  %v762_v43 = vrot.slane %v512_v38, %v1864_v1 }
 0x1cd   : > { %704 = vmatprep.subr.bf16.mxu1 %v1827_v44 }
 0x1d0   : > { %705 = vmatpush1.bf16.msra.mxu1 %v1829_v45 }
 0x1d3   : > { %723 = vmatmul.mubr.bf16.vlgmr.msra.gmra.mrb[4].mxu1 %v523_v3 }
 0x2a6   : > { %v724_v42 = vpop.f32.mrb[4].mxu1 }
 0x2a7   : > { %v741_v44 = vmul.f32 %v740_v39, %v724_v42  ;;  %v726_v45 = vpop.f32.mrb[5].mxu1 }
 0x2a8   : > { %v753_v4 = vmul.f32 %v752_v40, %v726_v45  ;;  %v757_v5 = vmul.f32 %v726_v45, %v724_v42  ;;  %v728_v6 = vpop.f32.mrb[6].mxu1 }
 0x2a9   : > { %v747_v7 = vadd.f32 %v746_v41, %v741_v44  ;;  %v742_v8 = vmul.f32 %v740_v39, %v728_v6  ;;  %v730_v9 = vpop.f32.mrb[7].mxu1 }
 0x2aa   : > { %v763_v10 = vmul.f32 %v762_v43, %v757_v5  ;;  %v754_v11 = vmul.f32 %v752_v40, %v730_v9  ;;  %v758_v12 = vmul.f32 %v730_v9, %v728_v6 }
 0x2ab   : > { %v755_v13 = vadd.f32 %v753_v4, %v747_v7  ;;  %v748_v14 = vadd.f32 %v746_v41, %v742_v8 }
 0x2ac   : > { %v764_v15 = vmul.f32 %v762_v43, %v758_v12 }
 0x2ad   : > { %v765_v16 = vadd.f32 %v763_v10, %v755_v13  ;;  %v756_v17 = vadd.f32 %v754_v11, %v748_v14 }
 0x2af   : > { %v766_v18 = vadd.f32 %v764_v15, %v756_v17 }
 0x2b1   : > { %v786_v19 = vpack.c.bf16 %v766_v18, %v765_v16 }
 0x2b3   : > { %v787_v20 = vunpack.c.l.bf16 %v786_v19  ;;  %v788_v21 = vunpack.c.h.bf16 %v786_v19 }
 0x2b5   : > { %v790_v22 = vsub.f32 %v766_v18, %v788_v21  ;;  %v789_v23 = vsub.f32 %v765_v16, %v787_v20 }
 0x2b7   : > { %v791_v25 = vpack.c.bf16 %v790_v22, %v789_v23 }
 0x2b9   : > { %910 = vmatmul.mubr.bf16.vlgmr.msra.gmra.mrb[4].mxu0 %v791_v25  ;;  %v792_v31 = vunpack.c.l.bf16 %v791_v25  ;;  %v793_v32 = vunpack.c.h.bf16 %v791_v25 }
 0x2ba   : > { %921 = vmatpush1.bf16.msra.mxu0 %v1834_v46  ;;  %952 = vmatprep.mubr.bf16.mxu0 %v1547_v0 }
 0x2bb   : > { %922 = vmatprep.subr.bf16.mxu0 %v1838_v48  ;;  %v794_v33 = vsub.f32 %v789_v23, %v792_v31  ;;  %v795_v34 = vsub.f32 %v790_v22, %v793_v32 }
 0x2bd   : > { %v796_v35 = vpack.c.bf16 %v795_v34, %v794_v33 }
 0x2be   : > { %923 = vmatpush1.bf16.msra.mxu0 %v1842_v49 }
 0x2bf   : > { %924 = vmatprep.subr.bf16.mxu0 %v1845_v50 }
 0x2c2   : > { %925 = vmatpush1.bf16.msra.mxu0 %v1848_v51 }
 0x2c3   : > { %926 = vmatprep.subr.bf16.mxu0 %v1851_v52 }
 0x2c6   : > { %927 = vmatpush1.bf16.msra.mxu0 %v1854_v54 }
 0x2c7   : > { %928 = vmatprep.subr.bf16.mxu0 %v1903_v24 }
 0x2ca   : > { %929 = vmatpush1.bf16.msra.mxu0 %v1905_v26 }
 0x2cb   : > { %930 = vmatprep.subr.bf16.mxu0 %v1909_v27 }
 0x2ce   : > { %931 = vmatpush1.bf16.msra.mxu0 %v1911_v28 }
 0x2cf   : > { %932 = vmatprep.subr.bf16.mxu0 %v1915_v29 }
 0x2d2   : > { %933 = vmatpush1.bf16.msra.mxu0 %v1917_v30 }
 0x2d3   : > { %934 = vmatprep.subr.bf16.mxu0 %v1921_v36 }
 0x2d6   : > { %935 = vmatpush1.bf16.msra.mxu0 %v1923_v37 }
 0x2d7   : > { %963 = vmatprep.subr.bf16.mxu0 %v1836_v47 }
 0x2d9   : > { %953 = vmatmul.mubr.bf16.vlgmr.msra.gmra.mrb[4].mxu0 %v786_v19 }
 0x2da   : > { %964 = vmatpush1.bf16.msra.mxu0 %v1834_v46  ;;  %995 = vmatprep.mubr.bf16.mxu0 %v1547_v0  ;;  %v785_v0 = vld [vmem:[#allocation7 + $0x10] sm:$0xff] }
 0x2db   : > { %965 = vmatprep.subr.bf16.mxu0 %v1838_v48  ;;  %v1013_v46 = vrot.slane %v785_v0, %v1858_v60  ;;  %v1025_v47 = vrot.slane %v785_v0, %v1860_v62  ;;  %v1019_v48 = vrot.slane %v785_v0, %v1862_v63 }
 0x2de   : > { %966 = vmatpush1.bf16.msra.mxu0 %v1842_v49 }
 0x2df   : > { %967 = vmatprep.subr.bf16.mxu0 %v1845_v50  ;;  %v1035_v50 = vrot.slane %v785_v0, %v1864_v1 }
 0x2e2   : > { %968 = vmatpush1.bf16.msra.mxu0 %v1848_v51 }
 0x2e3   : > { %969 = vmatprep.subr.bf16.mxu0 %v1851_v52 }
 0x2e6   : > { %970 = vmatpush1.bf16.msra.mxu0 %v1854_v54 }
 0x2e7   : > { %971 = vmatprep.subr.bf16.mxu0 %v1903_v24 }
 0x2ea   : > { %972 = vmatpush1.bf16.msra.mxu0 %v1905_v26 }
 0x2eb   : > { %973 = vmatprep.subr.bf16.mxu0 %v1909_v27 }
 0x2ee   : > { %974 = vmatpush1.bf16.msra.mxu0 %v1911_v28 }
 0x2ef   : > { %975 = vmatprep.subr.bf16.mxu0 %v1915_v29 }
 0x2f2   : > { %976 = vmatpush1.bf16.msra.mxu0 %v1917_v30 }
 0x2f3   : > { %977 = vmatprep.subr.bf16.mxu0 %v1921_v36 }
 0x2f6   : > { %978 = vmatpush1.bf16.msra.mxu0 %v1923_v37 }
 0x2f9   : > { %996 = vmatmul.mubr.bf16.vlgmr.msra.gmra.mrb[4].mxu0 %v796_v35 }
 0x3cc   : > { %v997_v49 = vpop.f32.mrb[4].mxu0 }
 0x3cd   : > { %v1014_v51 = vmul.f32 %v1013_v46, %v997_v49  ;;  %v999_v52 = vpop.f32.mrb[5].mxu0 }
 0x3ce   : > { %v1026_v54 = vmul.f32 %v1025_v47, %v999_v52  ;;  %v1030_v53 = vmul.f32 %v999_v52, %v997_v49  ;;  %v1001_v55 = vpop.f32.mrb[6].mxu0 }
 0x3cf   : > { %v1020_v56 = vadd.f32 %v1019_v48, %v1014_v51  ;;  %v1015_v58 = vmul.f32 %v1013_v46, %v1001_v55  ;;  %v1003_v59 = vpop.f32.mrb[7].mxu0 }
 0x3d0   : > { %v1036_v57 = vmul.f32 %v1035_v50, %v1030_v53  ;;  %v1027_v60 = vmul.f32 %v1025_v47, %v1003_v59  ;;  %v1031_v62 = vmul.f32 %v1003_v59, %v1001_v55 }
 0x3d1   : > { %v1028_v63 = vadd.f32 %v1026_v54, %v1020_v56  ;;  %v1021_v61 = vadd.f32 %v1019_v48, %v1015_v58 }
 0x3d2   : > { %v1037_v1 = vmul.f32 %v1035_v50, %v1031_v62 }
 0x3d3   : > { %v1038_v2 = vadd.f32 %v1036_v57, %v1028_v63  ;;  %v1029_v3 = vadd.f32 %v1027_v60, %v1021_v61 }
 0x3d5   : > { %1040 = vst [vmem:[%s217_s18] sm:$0xff] %v1038_v2  ;;  %v1039_v24 = vadd.f32 %v1037_v1, %v1029_v3 }
 0x3d7   : > { %1041 = vst [vmem:[%s217_s18 + $0x8] sm:$0xff] %v1039_v24 }
 0x3d8   : > { %1483 = shalt.err (!%p1480_p1)
}
 0x3d9   : > { %s1484_s10 = scalar_lea.hbm %s1977_s27, 256  ;;  %s1488_s26 = scalar_lea.hbm %s2024_s3, 512 }
 0x3da   : > { %p1485_p13 = scmp.ne.s32.totalorder %s1977_s27, %s1484_s10  ;;  %p1489_p4 = scmp.lt.u32.totalorder %s1977_s27, %s2024_s3 }
 0x3db   : > { %p1490_p5 = scmp.lt.u32.totalorder %s1488_s26, %s1484_s10  ;;  %p1492_p11 = scmp.lt.u32.totalorder %s1484_s10, %s1977_s27 }
 0x3dc   : > { %p1486_p6 = pnand %p1485_p13, %p2038_p0 }
 0x3dd   : > { %p1491_p8 = por %p1490_p5, %p1489_p4 }
 0x3de   : > { %p1487_p10 = pneg %p1486_p6 }
 0x3df   : > { %p1493_p2 = por %p1492_p11, %p1491_p8 }
 0x3e1   : > { %p1494_p3 = pnand %p1493_p2, %p1487_p10 }
 0x3e3   : > { %1497 = shalt.err (!%p1494_p3)
}
 0x3e4   : > { %s1549_s28 = smov 128   ;;  %s1550_s18 = smov 8  }
 0x3e5   : > { %1250 = dma.vmem_to_hbm [thread:$0]  (%p2038_p0), %s1972_s20, 256, %s1977_s27, %s1043_s22, %s1549_s28, %s1549_s28, %s1550_s18  }
 0x3e6 PF: > { %s1071_s7 = sand.u32 1, %s1528_s12   ;;  %p2039_p7 = scmp.ne.s32.totalorder %s2029_s19, 0 }
 0x3e7   : > { %p2040_p9 = scmp.ge.s32.totalorder %s1540_s15, 2  ;;  %s1072_s8 = scalar_lea.sflag [#allocation4], %s1071_s7 }
 0x3e9   : > { %p1264_p12 = pnand %p2040_p9, %p2039_p7 }
 0x3eb   : > { %1523 = dma.done.wait (!%p1264_p12), %s1072_s8, 256  }
 0x3ec   : > { %1525 = vsyncadd (!%p1264_p12), %s1072_s8, 4294967040  ;;  %p17_p1 = scmp.ge.s32.totalorder %s1687_s23, 4   ;;  %s2041_s12 = smov %s1532_s13 }
 0x3ed   : > { %s2042_s13 = smov %s1536_s14  ;;  %s2043_s14 = smov %s1703_s9 }
 0x3ee   : > { %s2044_s15 = smov %s1687_s23  ;;  %19 = sbr.rel (!%p17_p1) target bundleno = 6 (0x6), region = 89 }
 0x3f5   :  { %1077 = vsyncpa [#allocation3], 1 }
 0x3f6   :  { %1079 = vsyncpa [#allocation3 + $0x1], 1 }
 0x3f7   :  { %1080 = vsyncpa [#allocation6], 1 }
 0x3f8   :  { %1081 = vsyncpa [#allocation4], 1 }
 0x3f9   :  { %1083 = vsyncpa [#allocation4 + $0x1], 1 }

</bundles_post_ra>
